<compile_context>
chip_gen: v5e
topology: v5e:2x2
jax: 0.10.0
libtpu: 0.0.40
codegen_flags: <defaults>
</compile_context>

<pallas_src>
import functools
import math

import jax
import jax.numpy as jnp
import numpy as np
from jax.experimental import pallas as pl
from jax.experimental.pallas import tpu as pltpu


def _round_up(x, m):
    return ((x + m - 1) // m) * m


def _time_encoder_kernel(*refs, groups, use_bias):
    # refs = (t_ref, e_ref[, b_ref], o_ref)
    #   t_ref : (tile_rows, groups)        flattened times, `groups` per slab row
    #   e_ref : (groups, groups*dim)       E[k, k*dim + j] = weight[j]
    #   b_ref : (1, groups*dim)            tiled bias (only when use_bias)
    #   o_ref : (tile_rows, groups*dim)    lane-dense output slab
    if use_bias:
        t_ref, e_ref, b_ref, o_ref = refs
    else:
        t_ref, e_ref, o_ref = refs
        b_ref = None

    t = t_ref[...]
    if groups == 1:
        # Degenerate case (dim is a multiple of 128 and already very wide):
        # plain broadcast multiply, no MXU needed.
        arg = t * e_ref[...]
    else:
        # Replicate-and-scale on the MXU.  HIGHEST precision (bf16x3 passes) is
        # required: default precision truncates t to bf16 and the phase error
        # in cos(t*w) would be large for big t.
        arg = jnp.dot(t, e_ref[...],
                      preferred_element_type=jnp.float32,
                      precision=jax.lax.Precision.HIGHEST)
    if use_bias:
        arg = arg + b_ref[...]
    o_ref[...] = jnp.cos(arg).astype(o_ref.dtype)


@functools.partial(
    jax.jit,
    static_argnames=("dim", "tile_rows", "out_dtype", "vmem_budget_bytes"))
def fixed_time_encoder(t, weight, bias=None, *, dim, tile_rows=None,
                       out_dtype=jnp.float32,
                       vmem_budget_bytes=6 * 1024 * 1024):
    """Pallas implementation of FixedTimeEncoder.forward.

    Args:
      t:      arbitrary-shaped float array of timestamps.
      weight: (dim,) or (dim, 1) float32 frequencies (== w.weight.squeeze(-1)).
      bias:   optional (dim,) float32 bias; None (the frozen all-zero default
              of the module) skips the add entirely.
      out_dtype: output dtype (f32 default = exact PyTorch parity; bf16 halves
              the HBM store traffic on the store-bound v5e).
    Returns:
      (N, dim) array with N = t.size (matches torch's (-1, dim) output).
    """
    t_flat = t.reshape(-1).astype(jnp.float32)
    n = t_flat.shape[0]

    # Lane folding: fold `groups` consecutive time values into one slab row so
    # the output last dim (lanes = groups*dim) is a multiple of 128 for ANY dim
    # (lcm rule), then widen toward 32 so the t input stream is lane-denser
    # while keeping the matmul depth K = groups (and E) small.
    g_min = 128 // math.gcd(dim, 128)
    groups = g_min
    while groups < 32 and 2 * groups * dim <= 8192:
        groups *= 2
    lanes = groups * dim

    r = pl.cdiv(max(n, 1), groups)            # rows of the lane-dense slab
    if tile_rows is None:
        # Double-buffered VMEM per slab row: output block + t block (whose last
        # dim pads up to 128 lanes in VMEM).
        bytes_per_row = 2 * 4 * (lanes + _round_up(groups, 128))
        max_tile_rows = max(8, (vmem_budget_bytes // bytes_per_row) // 8 * 8)
        # Split r as evenly as possible: avoids a mostly-padding trailing tile.
        num_tiles = pl.cdiv(r, max_tile_rows)
        tile_rows = _round_up(pl.cdiv(r, num_tiles), 8)
    assert tile_rows % 8 == 0, "tile_rows must be a multiple of 8"
    r_pad = _round_up(r, tile_rows)

    t_slab = jnp.pad(t_flat, (0, r_pad * groups - n)).reshape(r_pad, groups)

    w = weight.reshape(dim).astype(jnp.float32)
    if groups == 1:
        e = w.reshape(1, dim)
    else:
        # E[k, k*dim + j] = w[j]  (block-diagonal expansion matrix, tiny).
        e = (jnp.eye(groups, dtype=jnp.float32)[:, :, None]
             * w[None, None, :]).reshape(groups, lanes)

    use_bias = bias is not None
    inputs = [t_slab, e]
    in_specs = [
        pl.BlockSpec((tile_rows, groups), lambda i: (i, 0)),   # t rows
        pl.BlockSpec(e.shape, lambda i: (0, 0)),               # E resident
    ]
    if use_bias:
        b_lanes = jnp.tile(bias.reshape(dim).astype(jnp.float32), groups)
        inputs.append(b_lanes.reshape(1, lanes))
        in_specs.append(pl.BlockSpec((1, lanes), lambda i: (0, 0)))

    kernel = functools.partial(_time_encoder_kernel, groups=groups,
                               use_bias=use_bias)
    out = pl.pallas_call(
        kernel,
        out_shape=jax.ShapeDtypeStruct((r_pad, lanes), out_dtype),
        grid_spec=pltpu.PrefetchScalarGridSpec(
            num_scalar_prefetch=0,
            grid=(r_pad // tile_rows,),
            in_specs=in_specs,
            out_specs=pl.BlockSpec((tile_rows, lanes), lambda i: (i, 0)),
        ),
        compiler_params=pltpu.CompilerParams(
            dimension_semantics=("parallel",),   # lets v7x shard rows over 2 TCs
            vmem_limit_bytes=32 * 1024 * 1024,   # safe on v5e/v6e/v7x
        ),
    )(*inputs)

    # (r_pad, groups*dim) row-major is the same memory as (r_pad*groups, dim):
    # the reshape + slice is free layout plumbing.
    return out.reshape(r_pad * groups, dim)[:n]


def make_params(dim):
    """Deterministic parameters exactly as in reset_parameters()."""
    w = (1.0 / 10.0 ** np.linspace(0, 9, dim, dtype=np.float32)).astype(np.float32)
    b = np.zeros((dim,), dtype=np.float32)
    return jnp.asarray(w), jnp.asarray(b)


if __name__ == "__main__":
    dim = 32
    weight, bias = make_params(dim)
    key = jax.random.PRNGKey(0)

    # --- module-sized example: t of shape (2, 8) -> N = 16 rows -------------
    t = jax.random.uniform(key, (2, 8), dtype=jnp.float32) * 100.0
    out = jax.block_until_ready(fixed_time_encoder(t, weight, dim=dim))
    ref = jnp.cos(t.reshape(-1, 1) * weight.reshape(1, dim) + bias.reshape(1, dim))
    # MXU HIGHEST (bf16x3) matmul rounds |arg|~100 a few ulps differently from
    # a single f32 multiply, so allow a small absolute slack on cos output.
    np.testing.assert_allclose(np.asarray(out), np.asarray(ref),
                               rtol=1e-4, atol=1e-4)
    assert out.shape == (t.size, dim)

    # --- multi-tile + explicit-bias path (grid > 1, exercises tail padding) -
    k1, k2 = jax.random.split(key)
    t2 = jax.random.uniform(k1, (3, 700), dtype=jnp.float32) * 50.0
    b2 = jax.random.normal(k2, (dim,), dtype=jnp.float32)
    out2 = jax.block_until_ready(
        fixed_time_encoder(t2, weight, b2, dim=dim, tile_rows=16))
    ref2 = jnp.cos(t2.reshape(-1, 1) * weight.reshape(1, dim) + b2.reshape(1, dim))
    np.testing.assert_allclose(np.asarray(out2), np.asarray(ref2),
                               rtol=1e-4, atol=1e-4)
    assert out2.shape == (t2.size, dim)

    # --- bf16 output path (store-bound v5e optimization) --------------------
    out3 = jax.block_until_ready(
        fixed_time_encoder(t, weight, dim=dim, out_dtype=jnp.bfloat16))
    np.testing.assert_allclose(np.asarray(out3, dtype=np.float32),
                               np.asarray(ref), rtol=0, atol=1.5e-2)
    assert out3.dtype == jnp.bfloat16

    print("KERNEL_OK")
</pallas_src>

<mosaic_0001>
module attributes {stable_mosaic.version = 11 : i64} {
  func.func @_time_encoder_kernel(%arg0: i32, %arg1: memref<8x32xf32, #tpu.memory_space<vmem>>, %arg2: memref<32x1024xf32, #tpu.memory_space<vmem>>, %arg3: memref<8x1024xf32, #tpu.memory_space<vmem>>) attributes {dimension_semantics = [#tpu.dimension_semantics<parallel>], iteration_bounds = array<i64: 1>, scalar_prefetch = 0 : i64, scratch_operands = 0 : i64, tpu.core_type = #tpu.core_type<tc>, window_params = [{transform_indices = @transform_0, window_bounds = array<i64: 8, 32>}, {pipeline_mode = #tpu.pipeline_mode<synchronous>, transform_indices = @transform_1, window_bounds = array<i64: 32, 1024>}, {transform_indices = @transform_2, window_bounds = array<i64: 8, 1024>}]} {
    %c0 = arith.constant 0 : index
    %c0_0 = arith.constant 0 : index
    %0 = vector.load %arg1[%c0, %c0_0] : memref<8x32xf32, #tpu.memory_space<vmem>>, vector<8x32xf32>
    %c0_1 = arith.constant 0 : index
    %c0_2 = arith.constant 0 : index
    %1 = vector.load %arg2[%c0_1, %c0_2] : memref<32x1024xf32, #tpu.memory_space<vmem>>, vector<32x1024xf32>
    %cst = arith.constant dense<0.000000e+00> : vector<8x1024xf32>
    %2 = tpu.matmul %0, %1, %cst {dimension_numbers = #tpu.dot_dimension_numbers<[1], [0], [0], [1], [0, 0, 1, 1], [], []>, precision = #tpu.contract_precision<fp32>} : vector<8x32xf32>, vector<32x1024xf32>, vector<8x1024xf32> -> vector<8x1024xf32>
    %3 = math.cos %2 : vector<8x1024xf32>
    %c0_3 = arith.constant 0 : index
    %c0_4 = arith.constant 0 : index
    %4 = vector.load %arg3[%c0_3, %c0_4] : memref<8x1024xf32, #tpu.memory_space<vmem>>, vector<8x1024xf32>
    tpu.vector_store %arg3[%c0_3, %c0_4], %3 {strides = array<i32>} : memref<8x1024xf32, #tpu.memory_space<vmem>>, vector<8x1024xf32>,
    return
  }
  func.func @transform_0(%arg0: i32) -> (i32, i32) {
    %c0_i32 = arith.constant 0 : i32
    %c0_i32_0 = arith.constant 0 : i32
    return %arg0, %c0_i32 : i32, i32
  }
  func.func @transform_1(%arg0: i32) -> (i32, i32) {
    %c0_i32 = arith.constant 0 : i32
    %c0_i32_0 = arith.constant 0 : i32
    %c0_i32_1 = arith.constant 0 : i32
    return %c0_i32, %c0_i32_0 : i32, i32
  }
  func.func @transform_2(%arg0: i32) -> (i32, i32) {
    %c0_i32 = arith.constant 0 : i32
    %c0_i32_0 = arith.constant 0 : i32
    return %arg0, %c0_i32 : i32, i32
  }
}

</mosaic_0001>

<bundles_post_ra>
// kernel: fixed_time_encoder.1
= control target key start
LH: loop header
LB: loop body
LE: loop exit
PB: predicated region body
PF: predicated region fallthrough
CT: control target
= control target key end

     0   :  { %vm44_vm0 = vcmask 261120   ;;  %s4255_s1 = inlined_call_operand.vmem [shape: f32[32,1024], index: 1, kind: input, shape index: {}]   ;;  %s4256_s0 = inlined_call_operand.vmem [shape: f32[8,32], index: 0, kind: input, shape index: {}]   ;;  %s4257_s2 = inlined_call_operand.vmem [shape: f32[8,1024], index: 2, kind: output, shape index: {}]  }
   0x1   :  { %v36_v0 = vld [vmem:[%s4255_s1 + $0xc0] sm:$0xff]  ;;  %v37_v8 = vld [vmem:[%s4255_s1 + $0xc8] sm:$0xff]  ;;  %v38_v53 = vld [vmem:[%s4255_s1 + $0xd0] sm:$0xff] }
   0x2   :  { %v28_v1 = vld [vmem:[%s4255_s1 + $0x80] sm:$0xff]  ;;  %v2834_v3 = vand.u32 4294901760, %v36_v0  ;;  %v2851_v11 = vand.u32 4294901760, %v37_v8  ;;  %v29_v12 = vld [vmem:[%s4255_s1 + $0x88] sm:$0xff]  ;;  %v30_v55 = vld [vmem:[%s4255_s1 + $0x90] sm:$0xff]  ;;  %v2932_v56 = vand.u32 4294901760, %v38_v53 }
   0x3   :  { %v20_v2 = vld [vmem:[%s4255_s1 + $0x40] sm:$0xff]  ;;  %v2836_v4 = vand.u32 4294901760, %v28_v1  ;;  %v21_v13 = vld [vmem:[%s4255_s1 + $0x48] sm:$0xff]  ;;  %v2872_v20 = vand.u32 4294901760, %v29_v12  ;;  %v22_v58 = vld [vmem:[%s4255_s1 + $0x50] sm:$0xff]  ;;  %v2939_v59 = vand.u32 4294901760, %v30_v55 }
   0x4   :  { %v2838_v5 = vand.u32 4294901760, %v20_v2  ;;  %v12_v6 = vld [vmem:[%s4255_s1] sm:$0xff]  ;;  %61 = vmatpush.msra.mxu0 %v2834_v3  ;;  %v90_v14 = vsub.f32 %v36_v0, %v2834_v3  ;;  %161 = vmatpush.msra.mxu3 %v2834_v3  ;;  %v2870_v19 = vsub.f32 %v37_v8, %v2851_v11  ;;  %v2874_v21 = vand.u32 4294901760, %v21_v13  ;;  %v13_v37 = vld [vmem:[%s4255_s1 + $0x8] sm:$0xff]  ;;  %v14_v62 = vld [vmem:[%s4255_s1 + $0x10] sm:$0xff] }
   0x5   :  { %v11_v7 = vld [vmem:[%s4256_s0] sm:$0xff]  ;;  %v2849_v9 = vand.u32 4294901760, %v12_v6  ;;  %v96_v15 = vsub.f32 %v28_v1, %v2836_v4  ;;  %v2884_v28 = vsub.f32 %v29_v12, %v2872_v20  ;;  %v2916_v47 = vand.u32 4294901760, %v13_v37  ;;  %v39_v63 = vld [vmem:[%s4255_s1 + $0xd8] sm:$0xff] }
   0x6   :  { %v46_v10 = vsel %vm44_vm0, %v11_v7, 0  ;;  %v102_v16 = vsub.f32 %v20_v2, %v2838_v5  ;;  %132 = vmatpush.msra.mxu2 %v90_v14  ;;  %63 = vmatpush.msra.mxu0 %v2836_v4  ;;  %v91_v22 = vand.u32 4294901760, %v90_v14  ;;  %v276_v26 = vand.u32 4294901760, %v2870_v19  ;;  %v31_v1 = vld [vmem:[%s4255_s1 + $0x98] sm:$0xff] }
   0x7   :  { %v2864_v17 = vand.u32 4294901760, %v46_v10  ;;  %v2867_v18 = vsub.f32 %v12_v6, %v2849_v9  ;;  %v97_v23 = vand.u32 4294901760, %v96_v15  ;;  %163 = vmatpush.msra.mxu3 %v2836_v4  ;;  %v2887_v29 = vsub.f32 %v21_v13, %v2874_v21  ;;  %v23_v6 = vld [vmem:[%s4255_s1 + $0x58] sm:$0xff] }
   0x8   :  { %v103_v25 = vand.u32 4294901760, %v102_v16  ;;  %135 = vmatpush.msra.mxu2 %v96_v15  ;;  %65 = vmatpush.msra.mxu0 %v2838_v5  ;;  %v92_v30 = vsub.f32 %v90_v14, %v91_v22  ;;  %v277_v34 = vsub.f32 %v2870_v19, %v276_v26  ;;  %v282_v35 = vand.u32 4294901760, %v2884_v28 }
   0x9   :  { %v2878_v24 = vsub.f32 %v46_v10, %v2864_v17  ;;  %v109_v27 = vand.u32 4294901760, %v2867_v18  ;;  %v98_v31 = vsub.f32 %v96_v15, %v97_v23  ;;  %165 = vmatpush.msra.mxu3 %v2838_v5  ;;  %v288_v36 = vand.u32 4294901760, %v2887_v29 }
   0xa   :  { %v104_v33 = vsub.f32 %v102_v16, %v103_v25  ;;  %v93_v38 = vand.u32 4294901760, %v92_v30  ;;  %138 = vmatpush.msra.mxu2 %v102_v16  ;;  %67 = vmatpush.msra.mxu0 %v2849_v9  ;;  %v278_v42 = vand.u32 4294901760, %v277_v34  ;;  %v283_v43 = vsub.f32 %v2884_v28, %v282_v35 }
   0xb   :  { %v2891_v32 = vand.u32 4294901760, %v2878_v24  ;;  %v99_v39 = vand.u32 4294901760, %v98_v31  ;;  %v110_v41 = vsub.f32 %v2867_v18, %v109_v27  ;;  %167 = vmatpush.msra.mxu3 %v2849_v9  ;;  %v289_v46 = vsub.f32 %v2887_v29, %v288_v36 }
   0xc   :  { %190 = vmatpush.msrb.mxu0 %v91_v22  ;;  %94 = vmatpush.msra.mxu1 %v93_v38  ;;  %v105_v45 = vand.u32 4294901760, %v104_v33  ;;  %v284_v48 = vand.u32 4294901760, %v283_v43  ;;  %v293_v50 = vsub.f32 %v13_v37, %v2916_v47  ;;  %v2945_v60 = vsub.f32 %v38_v53, %v2932_v56  ;;  %v32_v43 = vld [vmem:[%s4255_s1 + $0xa0] sm:$0xff]  ;;  %v33_v53 = vld [vmem:[%s4255_s1 + $0xa8] sm:$0xff] }
   0xd   :  { %v71_v40 = vsub.f32 %v2878_v24, %v2891_v32  ;;  %141 = vmatpush.msra.mxu2 %v2867_v18  ;;  %171 = vmatmul.f32.vlgmr.msra.gmra.mxu3 %v2891_v32  ;;  %v111_v49 = vand.u32 4294901760, %v110_v41  ;;  %v290_v51 = vand.u32 4294901760, %v289_v46  ;;  %v2947_v61 = vand.u32 4294901760, %v22_v58  ;;  %v40_v41 = vld [vmem:[%s4255_s1 + $0xe0] sm:$0xff] }
   0xe   :  { %144 = vmatmul.f32.vlgmr.msra.gmra.mxu2 %v2878_v24  ;;  %100 = vmatpush.msra.mxu1 %v99_v39  ;;  %v294_v52 = vand.u32 4294901760, %v293_v50  ;;  %v2961_v0 = vsub.f32 %v30_v55, %v2939_v59  ;;  %v2968_v2 = vand.u32 4294901760, %v14_v62  ;;  %v2984_v7 = vand.u32 4294901760, %v31_v1  ;;  %v24_v46 = vld [vmem:[%s4255_s1 + $0x60] sm:$0xff] }
   0xf   :  { %v2911_v44 = vand.u32 4294901760, %v71_v40  ;;  %246 = vmatpush.msrb.mxu2 %v2851_v11  ;;  %279 = vmatpush.msrb.mxu3 %v278_v42 }
  0x10   :  { %106 = vmatpush.msra.mxu1 %v105_v45  ;;  %194 = vmatpush.msrb.mxu0 %v97_v23  ;;  %v295_v54 = vsub.f32 %v293_v50, %v294_v52  ;;  %v467_v8 = vand.u32 4294901760, %v2961_v0  ;;  %v2996_v10 = vsub.f32 %v14_v62, %v2968_v2  ;;  %v3010_v15 = vsub.f32 %v31_v1, %v2984_v7 }
  0x11   :  { %73 = vmatmul.f32.vlgmr.msra.gmra.mxu0 %v2911_v44  ;;  %248 = vmatpush.msrb.mxu2 %v2872_v20  ;;  %v3080_v45 = vand.u32 4294901760, %v40_v41 }
  0x12   :  { %285 = vmatpush.msrb.mxu3 %v284_v48  ;;  %112 = vmatpush.msra.mxu1 %v111_v49  ;;  %v296_v57 = vand.u32 4294901760, %v295_v54  ;;  %v468_v18 = vsub.f32 %v2961_v0, %v467_v8  ;;  %v3096_v49 = vand.u32 4294901760, %v24_v46 }
  0x13   :  { %198 = vmatpush.msrb.mxu0 %v103_v25  ;;  %114 = vmatmul.f32.vlgmr.msra.gmra.mxu1 %v2864_v17  ;;  %v652_v25 = vand.u32 4294901760, %v3010_v15  ;;  %v3094_v48 = vsub.f32 %v40_v41, %v3080_v45 }
  0x14   :  { %250 = vmatpush.msrb.mxu2 %v2874_v21  ;;  %221 = vmatpush.msrb.mxu1 %v2834_v3  ;;  %v2970_v3 = vand.u32 4294901760, %v39_v63 }
  0x15   :  { %291 = vmatpush.msrb.mxu3 %v290_v51  ;;  %202 = vmatpush.msrb.mxu0 %v109_v27  ;;  %v469_v27 = vand.u32 4294901760, %v468_v18  ;;  %v653_v33 = vsub.f32 %v3010_v15, %v652_v25  ;;  %v41_v51 = vld [vmem:[%s4255_s1 + $0xe8] sm:$0xff] }
  0x16   :  { %252 = vmatpush.msrb.mxu2 %v2916_v47  ;;  %223 = vmatpush.msrb.mxu1 %v2836_v4  ;;  %v461_v4 = vand.u32 4294901760, %v2945_v60  ;;  %v2999_v12 = vsub.f32 %v39_v63, %v2970_v3  ;;  %v3119_v55 = vand.u32 4294901760, %v41_v51 }
  0x17   :  { %297 = vmatpush.msrb.mxu3 %v296_v57  ;;  %258 = vmatmul.f32.vlgmr.msrb.gmra.mxu2 %v2911_v44  ;;  %v654_v38 = vand.u32 4294901760, %v653_v33  ;;  %v3126_v57 = vsub.f32 %v24_v46, %v3096_v49  ;;  %v26_v33 = vld [vmem:[%s4255_s1 + $0x70] sm:$0xff]  ;;  %v27_v46 = vld [vmem:[%s4255_s1 + $0x78] sm:$0xff] }
  0x18   :  { %225 = vmatpush.msrb.mxu1 %v2838_v5  ;;  %299 = vmatmul.f32.vlgmr.msrb.gmra.mxu3 %v2864_v17  ;;  %v2977_v5 = vsub.f32 %v22_v58, %v2947_v61  ;;  %v462_v13 = vsub.f32 %v2945_v60, %v461_v4  ;;  %v25_v58 = vld [vmem:[%s4255_s1 + $0x68] sm:$0xff]  ;;  %v3148_v63 = vsub.f32 %v41_v51, %v3119_v55 }
  0x19   :  { %204 = vmatmul.f32.vlgmr.msrb.gmra.mxu0 %v2864_v17  ;;  %375 = vmatpush.msra.mxu2 %v276_v26 }
  0x1a   :  { %317 = vmatpush.msra.mxu0 %v2870_v19  ;;  %406 = vmatpush.msra.mxu3 %v2851_v11  ;;  %v473_v14 = vand.u32 4294901760, %v2977_v5  ;;  %v646_v19 = vand.u32 4294901760, %v2999_v12 }
  0x1b   :  { %227 = vmatpush.msrb.mxu1 %v2849_v9  ;;  %379 = vmatpush.msra.mxu2 %v282_v35  ;;  %v15_v9 = vld [vmem:[%s4255_s1 + $0x18] sm:$0xff] }
  0x1c   :  { %320 = vmatpush.msra.mxu0 %v2884_v28  ;;  %408 = vmatpush.msra.mxu3 %v2872_v20  ;;  %v3012_v16 = vand.u32 4294901760, %v15_v9  ;;  %v474_v23 = vsub.f32 %v2977_v5, %v473_v14  ;;  %v647_v28 = vsub.f32 %v2999_v12, %v646_v19 }
  0x1d   :  { %229 = vmatmul.f32.vlgmr.msrb.gmra.mxu1 %v2864_v17  ;;  %383 = vmatpush.msra.mxu2 %v288_v36 }
  0x1e   :  { %346 = vmatpush.msra.mxu1 %v2851_v11  ;;  %323 = vmatpush.msra.mxu0 %v2887_v29  ;;  %v3001_v11 = vand.u32 4294901760, %v23_v6  ;;  %v3035_v26 = vsub.f32 %v15_v9, %v3012_v16  ;;  %v475_v31 = vand.u32 4294901760, %v474_v23  ;;  %v648_v35 = vand.u32 4294901760, %v647_v28  ;;  %v42_v28 = vld [vmem:[%s4255_s1 + $0xf0] sm:$0xff] }
  0x1f   :  { %410 = vmatpush.msra.mxu3 %v2874_v21  ;;  %387 = vmatpush.msra.mxu2 %v294_v52 }
  0x20   :  { %348 = vmatpush.msra.mxu1 %v2872_v20  ;;  %326 = vmatpush.msra.mxu0 %v293_v50  ;;  %v479_v20 = vand.u32 4294901760, %v2996_v10  ;;  %v3024_v22 = vsub.f32 %v23_v6, %v3001_v11  ;;  %v664_v34 = vand.u32 4294901760, %v3035_v26  ;;  %v16_v50 = vld [vmem:[%s4255_s1 + $0x20] sm:$0xff]  ;;  %v1016_v6 = vand.u32 4294901760, %v3148_v63 }
  0x21   :  { %412 = vmatpush.msra.mxu3 %v2916_v47  ;;  %329 = vmatmul.f32.vlgmr.msra.gmra.mxu0 %v2878_v24  ;;  %v3117_v54 = vand.u32 4294901760, %v16_v50 }
  0x22   :  { %350 = vmatpush.msra.mxu1 %v2874_v21  ;;  %389 = vmatmul.f32.vlgmr.msra.gmra.mxu2 %v2864_v17  ;;  %v463_v21 = vand.u32 4294901760, %v462_v13  ;;  %v480_v29 = vsub.f32 %v2996_v10, %v479_v20  ;;  %v658_v30 = vand.u32 4294901760, %v3024_v22  ;;  %v665_v39 = vsub.f32 %v3035_v26, %v664_v34 }
  0x23   :  { %414 = vmatmul.f32.vlgmr.msra.gmra.mxu3 %v2864_v17  ;;  %502 = vmatpush.msrb.mxu2 %v2945_v60  ;;  %v3145_v62 = vsub.f32 %v16_v50, %v3117_v54 }
  0x24   :  { %431 = vmatpush.msrb.mxu0 %v2932_v56  ;;  %531 = vmatpush.msrb.mxu3 %v2932_v56  ;;  %v481_v36 = vand.u32 4294901760, %v480_v29  ;;  %v659_v37 = vsub.f32 %v3024_v22, %v658_v30  ;;  %v666_v42 = vand.u32 4294901760, %v665_v39 }
  0x25   :  { %352 = vmatpush.msra.mxu1 %v2916_v47  ;;  %505 = vmatpush.msrb.mxu2 %v2961_v0  ;;  %v3089_v47 = vand.u32 4294901760, %v32_v43  ;;  %v3150_v0 = vand.u32 4294901760, %v25_v58 }
  0x26   :  { %433 = vmatpush.msrb.mxu0 %v2939_v59  ;;  %533 = vmatpush.msrb.mxu3 %v2939_v59  ;;  %v660_v40 = vand.u32 4294901760, %v659_v37  ;;  %v18_v37 = vld [vmem:[%s4255_s1 + $0x30] sm:$0xff] }
  0x27   :  { %356 = vmatmul.f32.vlgmr.msra.gmra.mxu1 %v2891_v32  ;;  %508 = vmatpush.msrb.mxu2 %v2977_v5  ;;  %v3110_v52 = vsub.f32 %v32_v43, %v3089_v47  ;;  %v3269_v41 = vand.u32 4294901760, %v18_v37 }
  0x28   :  { %464 = vmatpush.msrb.mxu1 %v463_v21  ;;  %435 = vmatpush.msrb.mxu0 %v2947_v61 }
  0x29   :  { %535 = vmatpush.msrb.mxu3 %v2947_v61  ;;  %511 = vmatpush.msrb.mxu2 %v2996_v10  ;;  %v837_v60 = vand.u32 4294901760, %v3110_v52  ;;  %v3297_v50 = vsub.f32 %v18_v37, %v3269_v41 }
  0x2a   :  { %470 = vmatpush.msrb.mxu1 %v469_v27  ;;  %437 = vmatpush.msrb.mxu0 %v2968_v2 }
  0x2b   :  { %537 = vmatpush.msrb.mxu3 %v2968_v2  ;;  %443 = vmatmul.f32.vlgmr.msrb.gmra.mxu0 %v2911_v44  ;;  %v838_v5 = vsub.f32 %v3110_v52, %v837_v60 }
  0x2c   :  { %476 = vmatpush.msrb.mxu1 %v475_v31  ;;  %514 = vmatmul.f32.vlgmr.msrb.gmra.mxu2 %v2878_v24  ;;  %v3232_v31 = vand.u32 4294901760, %v42_v28 }
  0x2d   :  { %541 = vmatmul.f32.vlgmr.msrb.gmra.mxu3 %v2891_v32  ;;  %616 = vmatpush.msra.mxu2 %v2970_v3  ;;  %v839_v13 = vand.u32 4294901760, %v838_v5 }
  0x2e   :  { %560 = vmatpush.msra.mxu0 %v461_v4  ;;  %649 = vmatpush.msra.mxu3 %v648_v35  ;;  %v3246_v35 = vsub.f32 %v42_v28, %v3232_v31 }
  0x2f   :  { %482 = vmatpush.msrb.mxu1 %v481_v36  ;;  %618 = vmatpush.msra.mxu2 %v2984_v7  ;;  %v3248_v36 = vand.u32 4294901760, %v26_v33 }
  0x30   :  { %564 = vmatpush.msra.mxu0 %v467_v8  ;;  %655 = vmatpush.msra.mxu3 %v654_v38  ;;  %v3176_v8 = vsub.f32 %v25_v58, %v3150_v0  ;;  %v43_v38 = vld [vmem:[%s4255_s1 + $0xf8] sm:$0xff]  ;;  %v1201_v43 = vand.u32 4294901760, %v3246_v35 }
  0x31   :  { %484 = vmatmul.f32.vlgmr.msrb.gmra.mxu1 %v2864_v17  ;;  %620 = vmatpush.msra.mxu2 %v3001_v11 }
  0x32   :  { %591 = vmatpush.msra.mxu1 %v2932_v56  ;;  %568 = vmatpush.msra.mxu0 %v473_v14  ;;  %v831_v56 = vand.u32 4294901760, %v3094_v48  ;;  %v1017_v14 = vsub.f32 %v3148_v63, %v1016_v6 }
  0x33   :  { %661 = vmatpush.msra.mxu3 %v660_v40  ;;  %622 = vmatpush.msra.mxu2 %v3012_v16  ;;  %v35_v40 = vld [vmem:[%s4255_s1 + $0xb8] sm:$0xff] }
  0x34   :  { %593 = vmatpush.msra.mxu1 %v2939_v59  ;;  %572 = vmatpush.msra.mxu0 %v479_v20  ;;  %v3133_v59 = vand.u32 4294901760, %v33_v53  ;;  %v832_v1 = vsub.f32 %v3094_v48, %v831_v56 }
  0x35   :  { %667 = vmatpush.msra.mxu3 %v666_v42  ;;  %574 = vmatmul.f32.vlgmr.msra.gmra.mxu0 %v2864_v17  ;;  %v3271_v42 = vand.u32 4294901760, %v43_v38 }
  0x36   :  { %595 = vmatpush.msra.mxu1 %v2947_v61  ;;  %628 = vmatmul.f32.vlgmr.msra.gmra.mxu2 %v2911_v44  ;;  %v17_v61 = vld [vmem:[%s4255_s1 + $0x28] sm:$0xff]  ;;  %v833_v9 = vand.u32 4294901760, %v832_v1 }
  0x37   :  { %669 = vmatmul.f32.vlgmr.msra.gmra.mxu3 %v2864_v17  ;;  %745 = vmatpush.msrb.mxu2 %v646_v19  ;;  %v3164_v4 = vand.u32 4294901760, %v17_v61  ;;  %v3300_v51 = vsub.f32 %v43_v38, %v3271_v42 }
  0x38   :  { %687 = vmatpush.msrb.mxu0 %v2999_v12  ;;  %776 = vmatpush.msrb.mxu3 %v2970_v3 }
  0x39   :  { %597 = vmatpush.msra.mxu1 %v2968_v2  ;;  %749 = vmatpush.msrb.mxu2 %v652_v25  ;;  %v843_v2 = vand.u32 4294901760, %v3126_v57  ;;  %v1386_v58 = vand.u32 4294901760, %v3300_v51 }
  0x3a   :  { %690 = vmatpush.msrb.mxu0 %v3010_v15  ;;  %778 = vmatpush.msrb.mxu3 %v2984_v7 }
  0x3b   :  { %599 = vmatmul.f32.vlgmr.msra.gmra.mxu1 %v2864_v17  ;;  %753 = vmatpush.msrb.mxu2 %v658_v30  ;;  %v844_v10 = vsub.f32 %v3126_v57, %v843_v2  ;;  %v34_v30 = vld [vmem:[%s4255_s1 + $0xb0] sm:$0xff] }
  0x3c   :  { %716 = vmatpush.msrb.mxu1 %v2970_v3  ;;  %693 = vmatpush.msrb.mxu0 %v3024_v22  ;;  %v3162_v3 = vsub.f32 %v33_v53, %v3133_v59  ;;  %v1018_v22 = vand.u32 4294901760, %v1017_v14  ;;  %v1202_v53 = vsub.f32 %v3246_v35, %v1201_v43 }
  0x3d   :  { %780 = vmatpush.msrb.mxu3 %v3001_v11  ;;  %757 = vmatpush.msrb.mxu2 %v664_v34  ;;  %v845_v18 = vand.u32 4294901760, %v844_v10  ;;  %v3241_v34 = vand.u32 4294901760, %v34_v30 }
  0x3e   :  { %718 = vmatpush.msrb.mxu1 %v2984_v7  ;;  %696 = vmatpush.msrb.mxu0 %v3035_v26  ;;  %v849_v7 = vand.u32 4294901760, %v3145_v62  ;;  %v1022_v12 = vand.u32 4294901760, %v3162_v3 }
  0x3f   :  { %782 = vmatpush.msrb.mxu3 %v3012_v16  ;;  %699 = vmatmul.f32.vlgmr.msrb.gmra.mxu0 %v2878_v24  ;;  %v3262_v39 = vsub.f32 %v34_v30, %v3241_v34 }
  0x40   :  { %720 = vmatpush.msrb.mxu1 %v3001_v11  ;;  %759 = vmatmul.f32.vlgmr.msrb.gmra.mxu2 %v2864_v17  ;;  %v3187_v11 = vsub.f32 %v17_v61, %v3164_v4  ;;  %v850_v15 = vsub.f32 %v3145_v62, %v849_v7  ;;  %v1023_v19 = vsub.f32 %v3162_v3, %v1022_v12  ;;  %v1203_v61 = vand.u32 4294901760, %v1202_v53 }
  0x41   :  { %784 = vmatmul.f32.vlgmr.msrb.gmra.mxu3 %v2864_v17  ;;  %872 = vmatpush.msra.mxu2 %v3094_v48  ;;  %v1207_v48 = vand.u32 4294901760, %v3262_v39  ;;  %v2806_v53 = vmov 2102212464  }
  0x42   :  { %801 = vmatpush.msra.mxu0 %v3080_v45  ;;  %901 = vmatpush.msra.mxu3 %v3080_v45  ;;  %v1034_v20 = vand.u32 4294901760, %v3187_v11  ;;  %v851_v21 = vand.u32 4294901760, %v850_v15  ;;  %v1024_v25 = vand.u32 4294901760, %v1023_v19 }
  0x43   :  { %722 = vmatpush.msrb.mxu1 %v3012_v16  ;;  %875 = vmatpush.msra.mxu2 %v3110_v52  ;;  %v1028_v16 = vand.u32 4294901760, %v3176_v8  ;;  %v3302_v52 = vand.u32 4294901760, %v27_v46 }
  0x44   :  { %803 = vmatpush.msra.mxu0 %v3089_v47  ;;  %903 = vmatpush.msra.mxu3 %v3089_v47  ;;  %v1035_v26 = vsub.f32 %v3187_v11, %v1034_v20 }
  0x45   :  { %726 = vmatmul.f32.vlgmr.msrb.gmra.mxu1 %v2891_v32  ;;  %878 = vmatpush.msra.mxu2 %v3126_v57  ;;  %v1029_v23 = vsub.f32 %v3176_v8, %v1028_v16  ;;  %v1208_v57 = vsub.f32 %v3262_v39, %v1207_v48 }
  0x46   :  { %834 = vmatpush.msra.mxu1 %v833_v9  ;;  %805 = vmatpush.msra.mxu0 %v3096_v49  ;;  %v1036_v29 = vand.u32 4294901760, %v1035_v26 }
  0x47   :  { %905 = vmatpush.msra.mxu3 %v3096_v49  ;;  %881 = vmatpush.msra.mxu2 %v3145_v62  ;;  %v1030_v27 = vand.u32 4294901760, %v1029_v23  ;;  %v1209_v1 = vand.u32 4294901760, %v1208_v57 }
  0x48   :  { %840 = vmatpush.msra.mxu1 %v839_v13  ;;  %807 = vmatpush.msra.mxu0 %v3117_v54 }
  0x49   :  { %907 = vmatpush.msra.mxu3 %v3117_v54  ;;  %813 = vmatmul.f32.vlgmr.msra.gmra.mxu0 %v2911_v44 }
  0x4a   :  { %846 = vmatpush.msra.mxu1 %v845_v18  ;;  %884 = vmatmul.f32.vlgmr.msra.gmra.mxu2 %v2878_v24 }
  0x4b   :  { %911 = vmatmul.f32.vlgmr.msra.gmra.mxu3 %v2891_v32  ;;  %986 = vmatpush.msrb.mxu2 %v3119_v55 }
  0x4c   :  { %930 = vmatpush.msrb.mxu0 %v831_v56  ;;  %1019 = vmatpush.msrb.mxu3 %v1018_v22 }
  0x4d   :  { %852 = vmatpush.msra.mxu1 %v851_v21  ;;  %988 = vmatpush.msrb.mxu2 %v3133_v59 }
  0x4e   :  { %934 = vmatpush.msrb.mxu0 %v837_v60  ;;  %1025 = vmatpush.msrb.mxu3 %v1024_v25  ;;  %v3328_v60 = vsub.f32 %v27_v46, %v3302_v52  ;;  %v2804_v46 = vmov 2475754826  }
  0x4f   :  { %854 = vmatmul.f32.vlgmr.msra.gmra.mxu1 %v2864_v17  ;;  %990 = vmatpush.msrb.mxu2 %v3150_v0 }
  0x50   :  { %961 = vmatpush.msrb.mxu1 %v3080_v45  ;;  %938 = vmatpush.msrb.mxu0 %v843_v2  ;;  %v3278_v45 = vsub.f32 %v26_v33, %v3248_v36  ;;  %v1387_v2 = vsub.f32 %v3300_v51, %v1386_v58 }
  0x51   :  { %1031 = vmatpush.msrb.mxu3 %v1030_v27  ;;  %992 = vmatpush.msrb.mxu2 %v3164_v4 }
  0x52   :  { %963 = vmatpush.msrb.mxu1 %v3089_v47  ;;  %942 = vmatpush.msrb.mxu0 %v849_v7  ;;  %v3285_v47 = vand.u32 4294901760, %v35_v40 }
  0x53   :  { %1037 = vmatpush.msrb.mxu3 %v1036_v29  ;;  %944 = vmatmul.f32.vlgmr.msrb.gmra.mxu0 %v2864_v17 }
  0x54   :  { %965 = vmatpush.msrb.mxu1 %v3096_v49  ;;  %998 = vmatmul.f32.vlgmr.msrb.gmra.mxu2 %v2911_v44  ;;  %v19_v49 = vld [vmem:[%s4255_s1 + $0x38] sm:$0xff] }
  0x55   :  { %1039 = vmatmul.f32.vlgmr.msrb.gmra.mxu3 %v2864_v17  ;;  %1115 = vmatpush.msra.mxu2 %v1016_v6  ;;  %v3316_v56 = vand.u32 4294901760, %v19_v49 }
  0x56   :  { %1057 = vmatpush.msra.mxu0 %v3148_v63  ;;  %1146 = vmatpush.msra.mxu3 %v3119_v55 }
  0x57   :  { %967 = vmatpush.msrb.mxu1 %v3117_v54  ;;  %1119 = vmatpush.msra.mxu2 %v1022_v12  ;;  %v1213_v54 = vand.u32 4294901760, %v3278_v45 }
  0x58   :  { %1060 = vmatpush.msra.mxu0 %v3162_v3  ;;  %1148 = vmatpush.msra.mxu3 %v3133_v59 }
  0x59   :  { %969 = vmatmul.f32.vlgmr.msrb.gmra.mxu1 %v2864_v17  ;;  %1123 = vmatpush.msra.mxu2 %v1028_v16  ;;  %v1214_v62 = vsub.f32 %v3278_v45, %v1213_v54 }
  0x5a   :  { %1086 = vmatpush.msra.mxu1 %v3119_v55  ;;  %1063 = vmatpush.msra.mxu0 %v3176_v8  ;;  %v3314_v55 = vsub.f32 %v35_v40, %v3285_v47  ;;  %v1388_v8 = vand.u32 4294901760, %v1387_v2 }
  0x5b   :  { %1150 = vmatpush.msra.mxu3 %v3150_v0  ;;  %1127 = vmatpush.msra.mxu2 %v1034_v20  ;;  %v1215_v5 = vand.u32 4294901760, %v1214_v62 }
  0x5c   :  { %1088 = vmatpush.msra.mxu1 %v3133_v59  ;;  %1066 = vmatpush.msra.mxu0 %v3187_v11  ;;  %v1219_v59 = vand.u32 4294901760, %v3297_v50  ;;  %v1392_v63 = vand.u32 4294901760, %v3314_v55 }
  0x5d   :  { %1152 = vmatpush.msra.mxu3 %v3164_v4  ;;  %1069 = vmatmul.f32.vlgmr.msra.gmra.mxu0 %v2878_v24 }
  0x5e   :  { %1090 = vmatpush.msra.mxu1 %v3150_v0  ;;  %1129 = vmatmul.f32.vlgmr.msra.gmra.mxu2 %v2864_v17  ;;  %v3337_v0 = vsub.f32 %v19_v49, %v3316_v56  ;;  %v1220_v3 = vsub.f32 %v3297_v50, %v1219_v59  ;;  %v1393_v6 = vsub.f32 %v3314_v55, %v1392_v63 }
  0x5f   :  { %1154 = vmatmul.f32.vlgmr.msra.gmra.mxu3 %v2864_v17  ;;  %1242 = vmatpush.msrb.mxu2 %v3246_v35 }
  0x60   :  { %1171 = vmatpush.msrb.mxu0 %v3232_v31  ;;  %1271 = vmatpush.msrb.mxu3 %v3232_v31  ;;  %v1404_v7 = vand.u32 4294901760, %v3337_v0  ;;  %v1221_v9 = vand.u32 4294901760, %v1220_v3  ;;  %v1394_v12 = vand.u32 4294901760, %v1393_v6 }
  0x61   :  { %1092 = vmatpush.msra.mxu1 %v3164_v4  ;;  %1245 = vmatpush.msrb.mxu2 %v3262_v39  ;;  %v1398_v4 = vand.u32 4294901760, %v3328_v60 }
  0x62   :  { %1173 = vmatpush.msrb.mxu0 %v3241_v34  ;;  %1273 = vmatpush.msrb.mxu3 %v3241_v34  ;;  %v1405_v11 = vsub.f32 %v3337_v0, %v1404_v7 }
  0x63   :  { %1096 = vmatmul.f32.vlgmr.msra.gmra.mxu1 %v2891_v32  ;;  %1248 = vmatpush.msrb.mxu2 %v3278_v45  ;;  %v1399_v10 = vsub.f32 %v3328_v60, %v1398_v4 }
  0x64   :  { %1204 = vmatpush.msrb.mxu1 %v1203_v61  ;;  %1175 = vmatpush.msrb.mxu0 %v3248_v36  ;;  %v1406_v14 = vand.u32 4294901760, %v1405_v11 }
  0x65   :  { %1275 = vmatpush.msrb.mxu3 %v3248_v36  ;;  %1251 = vmatpush.msrb.mxu2 %v3297_v50  ;;  %v1400_v13 = vand.u32 4294901760, %v1399_v10  ;;  %v2805_v50 = vmov 2131351028  }
  0x66   :  { %1210 = vmatpush.msrb.mxu1 %v1209_v1  ;;  %1177 = vmatpush.msrb.mxu0 %v3269_v41 }
  0x67   :  { %1277 = vmatpush.msrb.mxu3 %v3269_v41  ;;  %1183 = vmatmul.f32.vlgmr.msrb.gmra.mxu0 %v2911_v44 }
  0x68   :  { %1216 = vmatpush.msrb.mxu1 %v1215_v5  ;;  %1254 = vmatmul.f32.vlgmr.msrb.gmra.mxu2 %v2878_v24 }
  0x69   :  { %1281 = vmatmul.f32.vlgmr.msrb.gmra.mxu3 %v2891_v32  ;;  %1356 = vmatpush.msra.mxu2 %v3271_v42 }
  0x6a   :  { %1300 = vmatpush.msra.mxu0 %v1201_v43  ;;  %1389 = vmatpush.msra.mxu3 %v1388_v8  ;;  %v2803_v43 = vmov 683565275  }
  0x6b   :  { %1222 = vmatpush.msrb.mxu1 %v1221_v9  ;;  %1358 = vmatpush.msra.mxu2 %v3285_v47 }
  0x6c   :  { %1304 = vmatpush.msra.mxu0 %v1207_v48  ;;  %1395 = vmatpush.msra.mxu3 %v1394_v12 }
  0x6d   :  { %1224 = vmatmul.f32.vlgmr.msrb.gmra.mxu1 %v2864_v17  ;;  %1360 = vmatpush.msra.mxu2 %v3302_v52 }
  0x6e   :  { %1331 = vmatpush.msra.mxu1 %v3232_v31  ;;  %1308 = vmatpush.msra.mxu0 %v1213_v54 }
  0x6f   :  { %1401 = vmatpush.msra.mxu3 %v1400_v13  ;;  %1362 = vmatpush.msra.mxu2 %v3316_v56 }
  0x70   :  { %1333 = vmatpush.msra.mxu1 %v3241_v34  ;;  %1312 = vmatpush.msra.mxu0 %v1219_v59  ;;  %v2808_v59 = vmov 1326507024  }
  0x71   :  { %1407 = vmatpush.msra.mxu3 %v1406_v14  ;;  %1314 = vmatmul.f32.vlgmr.msra.gmra.mxu0 %v2864_v17 }
  0x72   :  { %1335 = vmatpush.msra.mxu1 %v3248_v36  ;;  %1368 = vmatmul.f32.vlgmr.msra.gmra.mxu2 %v2911_v44 }
  0x73   :  { %1409 = vmatmul.f32.vlgmr.msra.gmra.mxu3 %v2864_v17  ;;  %1485 = vmatpush.msrb.mxu2 %v1386_v58 }
  0x74   :  { %1427 = vmatpush.msrb.mxu0 %v3300_v51  ;;  %1337 = vmatpush.msra.mxu1 %v3269_v41 }
  0x75   :  { %1516 = vmatpush.msrb.mxu3 %v3271_v42  ;;  %1489 = vmatpush.msrb.mxu2 %v1392_v63 }
  0x76   :  { %1430 = vmatpush.msrb.mxu0 %v3314_v55  ;;  %1339 = vmatmul.f32.vlgmr.msra.gmra.mxu1 %v2864_v17 }
  0x77   :  { %1518 = vmatpush.msrb.mxu3 %v3285_v47  ;;  %1456 = vmatpush.msrb.mxu1 %v3271_v42 }
  0x78   :  { %1493 = vmatpush.msrb.mxu2 %v1398_v4  ;;  %1433 = vmatpush.msrb.mxu0 %v3328_v60 }
  0x79   :  { %1520 = vmatpush.msrb.mxu3 %v3302_v52  ;;  %1458 = vmatpush.msrb.mxu1 %v3285_v47 }
  0x7a   :  { %1497 = vmatpush.msrb.mxu2 %v1404_v7  ;;  %1436 = vmatpush.msrb.mxu0 %v3337_v0 }
  0x7b   :  { %1499 = vmatmul.f32.vlgmr.msrb.gmra.mxu2 %v2864_v17  ;;  %1439 = vmatmul.f32.vlgmr.msrb.gmra.mxu0 %v2878_v24 }
  0x7c   :  { %1460 = vmatpush.msrb.mxu1 %v3302_v52  ;;  %1522 = vmatpush.msrb.mxu3 %v3316_v56 }
  0x7d   :  { %1524 = vmatmul.f32.vlgmr.msrb.gmra.mxu3 %v2864_v17 }
  0x7e   :  { %1462 = vmatpush.msrb.mxu1 %v3316_v56  ;;  %v2807_v56 = vmov 920167782  }
  0x7f   :  { %1466 = vmatmul.f32.vlgmr.msrb.gmra.mxu1 %v2891_v32 }
  0x8e   :  { %v74_v44 = vpop.f32.mrf.mxu0 }
  0x90   :  { %v115_v15 = vpop.f32.mrf.mxu1  ;;  %v172_v20 = vpop.f32.mrf.mxu3 }
  0x91   :  { %v145_v16 = vpop.f32.mrf.mxu2  ;;  %v116_v18 = vadd.f32 %v115_v15, %v74_v44 }
  0x93   :  { %v146_v19 = vadd.f32 %v145_v16, %v116_v18 }
  0x95   :  { %v173_v22 = vadd.f32 %v172_v20, %v146_v19 }
  0x96   :  { %v205_v21 = vpop.f32.mrf.mxu0 }
  0x97   :  { %v206_v23 = vadd.f32 %v205_v21, %v173_v22 }
  0x9a   :  { %v230_v24 = vpop.f32.mrf.mxu1  ;;  %v259_v28 = vpop.f32.mrf.mxu2 }
  0x9b   :  { %v3392_v25 = vadd.f32 %v230_v24, %v206_v23  ;;  %v300_v29 = vpop.f32.mrf.mxu3 }
  0x9c   :  { %v301_v31 = vadd.f32 %v300_v29, %v259_v28 }
  0x9d   :  { %v1531_v26 = vand.u32 2139095040, %v3392_v25  ;;  %v1528_v32 = vand.u32 2147483647, %v3392_v25 }
  0x9e   :  { %v330_v33 = vpop.f32.mrf.mxu0 }
  0x9f   :  { %v1532_v27 = vshrl.u32 %v1531_v26, 23  ;;  %v1535_v34 = vand.u32 8388607, %v1528_v32  ;;  %v331_v38 = vadd.f32 %v330_v33, %v301_v31 }
  0xa1   :  { %v2772_v17 = vadd.s32 4294967169, %v1532_v27  ;;  %v1536_v41 = vor.u32 8388608, %v1535_v34 }
  0xa3   :  { %v1538_v30 = vadd.s32 1, %v2772_v17  ;;  %v3411_v3 = vshll.u32 %v1536_v41, 8 }
  0xa4   :  { %v357_v36 = vpop.f32.mrf.mxu1 }
  0xa5   :  { %vm1539_vm1 = vcmp.gt.s32.totalorder %v1538_v30, 0  ;;  %v358_v40 = vadd.f32 %v357_v36, %v331_v38  ;;  %v390_v48 = vpop.f32.mrf.mxu2  ;;  %v1577_v14 = vand.u32 65535, %v3411_v3  ;;  %v1578_v44 = vshrl.u32 %v3411_v3, 16 }
  0xa6   :  { %v1540_v35 = vsel %vm1539_vm1, %v1538_v30, 0  ;;  %v415_v8 = vpop.f32.mrf.mxu3 }
  0xa7   :  { %v1542_v37 = vand.u32 31, %v1540_v35  ;;  %v3398_v42 = vshrl.u32 %v1540_v35, 5  ;;  %v391_v0 = vadd.f32 %v390_v48, %v358_v40  ;;  %v2809_v40 = vmov 0  }
  0xa9   :  { %v1543_v39 = vsub.s32 32, %v1542_v37  ;;  %v1545_v45 = vshll.u32 %v2803_v43, %v1542_v37  ;;  %v1548_v47 = vshll.u32 %v2804_v46, %v1542_v37  ;;  %v1551_v52 = vshll.u32 %v2805_v50, %v1542_v37 }
  0xaa   :  { %v1554_v55 = vshll.u32 %v2806_v53, %v1542_v37  ;;  %v1557_v58 = vshll.u32 %v2807_v56, %v1542_v37  ;;  %vm1560_vm2 = vcmp.lt.s32.totalorder %v3398_v42, 1  ;;  %vm1563_vm3 = vcmp.lt.s32.totalorder %v3398_v42, 4 }
  0xab   :  { %v1546_v49 = vshrl.u32 %v2804_v46, %v1543_v39  ;;  %v1549_v51 = vshrl.u32 %v2805_v50, %v1543_v39  ;;  %v1552_v54 = vshrl.u32 %v2806_v53, %v1543_v39  ;;  %v1555_v57 = vshrl.u32 %v2807_v56, %v1543_v39 }
  0xac   :  { %v1558_v60 = vshrl.u32 %v2808_v59, %v1543_v39  ;;  %vm1562_vm4 = vcmp.lt.s32.totalorder %v3398_v42, 3  ;;  %vm1561_vm5 = vcmp.lt.s32.totalorder %v3398_v42, 2  ;;  %v3428_v12 = vadd.f32 %v415_v8, %v391_v0 }
  0xad   :  { %v1547_v61 = vor.u32 %v1546_v49, %v1545_v45  ;;  %v1550_v62 = vor.u32 %v1549_v51, %v1548_v47  ;;  %v1553_v63 = vor.u32 %v1552_v54, %v1551_v52  ;;  %v1556_v1 = vor.u32 %v1555_v57, %v1554_v55 }
  0xae   :  { %v1559_v2 = vor.u32 %v1558_v60, %v1557_v58  ;;  %v1544_v20 = vshrl.u32 %v2803_v43, %v1543_v39  ;;  %v1685_v24 = vand.u32 2139095040, %v3428_v12  ;;  %v1682_v31 = vand.u32 2147483647, %v3428_v12  ;;  %v485_v55 = vpop.f32.mrf.mxu1 }
  0xaf   :  { %v1568_v4 = vsel %vm1560_vm2, %v1547_v61, %v1550_v62  ;;  %v1572_v5 = vsel %vm1560_vm2, %v1550_v62, %v1553_v63  ;;  %v1569_v6 = vsel %vm1563_vm3, %v1556_v1, 920167782  ;;  %v1565_v22 = vsel %vm1563_vm3, %v1553_v63, 2102212464 }
  0xb0   :  { %v1573_v7 = vsel %vm1563_vm3, %v1559_v2, 1326507024  ;;  %v1570_v9 = vsel %vm1562_vm4, %v1553_v63, %v1569_v6  ;;  %v1564_v26 = vsel %vm1560_vm2, %v1544_v20, %v1547_v61  ;;  %v1566_v29 = vsel %vm1562_vm4, %v1550_v62, %v1565_v22  ;;  %v444_v2 = vpop.f32.mrf.mxu0 }
  0xb1   :  { %v1574_v10 = vsel %vm1562_vm4, %v1556_v1, %v1573_v7  ;;  %v1571_v11 = vsel %vm1561_vm5, %v1568_v4, %v1570_v9  ;;  %v1686_v39 = vshrl.u32 %v1685_v24, 23  ;;  %v1567_v62 = vsel %vm1561_vm5, %v1564_v26, %v1566_v29 }
  0xb2   :  { %v1575_v13 = vsel %vm1561_vm5, %v1572_v5, %v1574_v10  ;;  %v1601_v18 = vand.u32 65535, %v1571_v11  ;;  %v1602_v19 = vshrl.u32 %v1571_v11, 16  ;;  %v1689_v1 = vand.u32 8388607, %v1682_v31  ;;  %v515_v10 = vpop.f32.mrf.mxu2 }
  0xb3   :  { %v1579_v15 = vand.u32 65535, %v1575_v13  ;;  %v1580_v16 = vshrl.u32 %v1575_v13, 16  ;;  %v2775_v51 = vadd.s32 4294967169, %v1686_v39  ;;  %v486_v6 = vadd.f32 %v485_v55, %v444_v2 }
  0xb4   :  { %v1604_v27 = vmul.u32 %v1602_v19, %v1577_v14  ;;  %v1605_v28 = vmul.u32 %v1601_v18, %v1578_v44  ;;  %v1603_v34 = vmul.u32 %v1601_v18, %v1577_v14  ;;  %v1606_v35 = vmul.u32 %v1602_v19, %v1578_v44 }
  0xb5   :  { %v1582_v21 = vmul.u32 %v1580_v16, %v1577_v14  ;;  %v1583_v23 = vmul.u32 %v1579_v15, %v1578_v44  ;;  %v1581_v17 = vmul.u32 %v1579_v15, %v1577_v14  ;;  %v1584_v33 = vmul.u32 %v1580_v16, %v1578_v44 }
  0xb6   :  { %v1607_v36 = vshll.u32 %v1604_v27, 16  ;;  %v1609_v45 = vshll.u32 %v1605_v28, 16  ;;  %v1692_v61 = vadd.s32 1, %v2775_v51  ;;  %v1608_v63 = vshrl.u32 %v1604_v27, 16 }
  0xb7   :  { %v1585_v30 = vshll.u32 %v1582_v21, 16  ;;  %v1587_v37 = vshll.u32 %v1583_v23, 16  ;;  %v1586_v57 = vshrl.u32 %v1582_v21, 16  ;;  %v1588_v4 = vshrl.u32 %v1583_v23, 16 }
  0xb8   :  { %vm1611_vm7 = vc.u32 %v1603_v34, %v1607_v36  ;;  %v1613_v47 = vadd.s32 %v1607_v36, %v1603_v34  ;;  %vm1693_vm10 = vcmp.gt.s32.totalorder %v1692_v61, 0  ;;  %v1610_v7 = vshrl.u32 %v1605_v28, 16 }
  0xb9   :  { %vm1589_vm6 = vc.u32 %v1581_v17, %v1585_v30  ;;  %v1591_v38 = vadd.s32 %v1585_v30, %v1581_v17  ;;  %v1612_v49 = vsel %vm1611_vm7, 1, %v2809_v40  ;;  %v1694_v9 = vsel %vm1693_vm10, %v1692_v61, 0 }
  0xba   :  { %v1590_v41 = vsel %vm1589_vm6, 1, %v2809_v40  ;;  %v1614_v54 = vadd.s32 %v1612_v49, %v1606_v35  ;;  %vm1615_vm9 = vc.u32 %v1613_v47, %v1609_v45  ;;  %v1617_v13 = vadd.s32 %v1613_v47, %v1609_v45 }
  0xbb   :  { %v1592_v48 = vadd.s32 %v1590_v41, %v1584_v33  ;;  %vm1593_vm8 = vc.u32 %v1591_v38, %v1587_v37  ;;  %v1616_v60 = vsel %vm1615_vm9, 1, %v2809_v40  ;;  %v1696_v14 = vand.u32 31, %v1694_v9  ;;  %v542_v41 = vpop.f32.mrf.mxu3 }
  0xbc   :  { %v1594_v52 = vsel %vm1593_vm8, 1, %v2809_v40  ;;  %v1618_v0 = vadd.s32 %v1616_v60, %v1614_v54  ;;  %v1621_v44 = vmul.u32 %v3411_v3, %v1567_v62  ;;  %v1690_v15 = vor.u32 8388608, %v1689_v1 }
  0xbd   :  { %v1596_v58 = vadd.s32 %v1594_v52, %v1592_v48  ;;  %v3457_v16 = vshrl.u32 %v1694_v9, 5  ;;  %v3459_v18 = vsub.s32 32, %v1696_v14  ;;  %v516_v19 = vadd.f32 %v515_v10, %v486_v6  ;;  %v600_v6 = vpop.f32.mrf.mxu1 }
  0xbe   :  { %v1619_v8 = vadd.s32 %v1618_v0, %v1608_v63  ;;  %v1699_v22 = vshll.u32 %v2803_v43, %v1696_v14  ;;  %v1702_v21 = vshll.u32 %v2804_v46, %v1696_v14  ;;  %v1705_v23 = vshll.u32 %v2805_v50, %v1696_v14  ;;  %v575_v63 = vpop.f32.mrf.mxu0 }
  0xbf   :  { %v1597_v5 = vadd.s32 %v1596_v58, %v1586_v57  ;;  %v1700_v24 = vshrl.u32 %v2804_v46, %v3459_v18  ;;  %v1703_v3 = vshrl.u32 %v2805_v50, %v3459_v18  ;;  %v1706_v26 = vshrl.u32 %v2806_v53, %v3459_v18 }
  0xc0   :  { %v1620_v42 = vadd.s32 %v1619_v8, %v1610_v7  ;;  %v1708_v27 = vshll.u32 %v2806_v53, %v1696_v14  ;;  %v1709_v29 = vshrl.u32 %v2807_v56, %v3459_v18  ;;  %v1711_v17 = vshll.u32 %v2807_v56, %v1696_v14 }
  0xc1   :  { %v3453_v11 = vadd.s32 %v1597_v5, %v1588_v4  ;;  %v1712_v30 = vshrl.u32 %v2808_v59, %v3459_v18  ;;  %v1701_v34 = vor.u32 %v1700_v24, %v1699_v22  ;;  %v3476_v35 = vor.u32 %v1703_v3, %v1702_v21 }
  0xc2   :  { %v1624_v20 = vadd.s32 1, %v1620_v42  ;;  %v3478_v36 = vor.u32 %v1706_v26, %v1705_v23  ;;  %v1710_v37 = vor.u32 %v1709_v29, %v1708_v27  ;;  %v3480_v39 = vshll.u32 %v1690_v15, 8 }
  0xc3   :  { %vm1623_vm11 = vc.u32 %v3453_v11, %v1617_v13  ;;  %v1713_v38 = vor.u32 %v1712_v30, %v1711_v17  ;;  %vm1714_vm12 = vcmp.lt.s32.totalorder %v3457_v16, 1  ;;  %vm1717_vm13 = vcmp.lt.s32.totalorder %v3457_v16, 4 }
  0xc4   :  { %v1625_v28 = vsel %vm1623_vm11, %v1624_v20, %v1620_v42  ;;  %v543_v47 = vadd.f32 %v542_v41, %v516_v19  ;;  %vm1716_vm14 = vcmp.lt.s32.totalorder %v3457_v16, 3  ;;  %v1722_v48 = vsel %vm1714_vm12, %v1701_v34, %v3476_v35 }
  0xc5   :  { %v1626_v33 = vadd.s32 %v1625_v28, %v1621_v44  ;;  %v1723_v49 = vsel %vm1717_vm13, %v1710_v37, 920167782  ;;  %v1726_v51 = vsel %vm1714_vm12, %v3476_v35, %v3478_v36  ;;  %v1727_v55 = vsel %vm1717_vm13, %v1713_v38, 1326507024 }
  0xc6   :  { %v1724_v54 = vsel %vm1716_vm14, %v3478_v36, %v1723_v49  ;;  %vm1715_vm15 = vcmp.lt.s32.totalorder %v3457_v16, 2  ;;  %v1728_v57 = vsel %vm1716_vm14, %v1710_v37, %v1727_v55  ;;  %v1731_v62 = vand.u32 65535, %v3480_v39 }
  0xc7   :  { %v1627_v45 = vadd.s32 536870912, %v1626_v33  ;;  %v1725_v60 = vsel %vm1715_vm15, %v1722_v48, %v1724_v54  ;;  %v1729_v61 = vsel %vm1715_vm15, %v1726_v51, %v1728_v57  ;;  %v1732_v0 = vshrl.u32 %v3480_v39, 16 }
  0xc8   :  { %v1733_v1 = vand.u32 65535, %v1729_v61  ;;  %v1734_v2 = vshrl.u32 %v1729_v61, 16  ;;  %v576_v4 = vadd.f32 %v575_v63, %v543_v47  ;;  %v1756_v9 = vshrl.u32 %v1725_v60, 16 }
  0xc9   :  { %v3494_v52 = vshrl.u32 %v1627_v45, 30  ;;  %v1755_v14 = vand.u32 65535, %v1725_v60  ;;  %v1622_v19 = vadd.s32 %v1617_v13, %v3453_v11  ;;  %v1698_v26 = vshrl.u32 %v2803_v43, %v3459_v18 }
  0xca   :  { %v1736_v7 = vmul.u32 %v1734_v2, %v1731_v62  ;;  %v1737_v8 = vmul.u32 %v1733_v1, %v1732_v0  ;;  %v1735_v42 = vmul.u32 %v1733_v1, %v1731_v62  ;;  %v3511_v15 = vadd.f32 %v600_v6, %v576_v4 }
  0xcb   :  { %v1629_v58 = vshll.u32 %v3494_v52, 30  ;;  %v1738_v22 = vmul.u32 %v1734_v2, %v1732_v0  ;;  %v1758_v3 = vmul.u32 %v1756_v9, %v1731_v62  ;;  %v1757_v28 = vmul.u32 %v1755_v14, %v1731_v62 }
  0xcc   :  { %v1739_v44 = vshll.u32 %v1736_v7, 16  ;;  %v1741_v21 = vshll.u32 %v1737_v8, 16  ;;  %v1759_v29 = vmul.u32 %v1755_v14, %v1732_v0  ;;  %v1718_v11 = vsel %vm1714_vm12, %v1698_v26, %v1701_v34 }
  0xcd   :  { %v1630_v5 = vsub.s32 %v1626_v33, %v1629_v58  ;;  %v1761_v33 = vshll.u32 %v1758_v3, 16  ;;  %v1740_v13 = vshrl.u32 %v1736_v7, 16  ;;  %v1760_v38 = vmul.u32 %v1756_v9, %v1732_v0 }
  0xce   :  { %vm1743_vm1 = vc.u32 %v1735_v42, %v1739_v44  ;;  %v1745_v24 = vadd.s32 %v1739_v44, %v1735_v42  ;;  %v1763_v47 = vshll.u32 %v1759_v29, 16  ;;  %v1839_v49 = vand.u32 2139095040, %v3511_v15 }
  0xcf   :  { %vm1631_vm0 = vcmp.lt.s32.totalorder %v1630_v5, 0  ;;  %v1632_v10 = vsub.s32 0, %v1630_v5  ;;  %v1744_v27 = vsel %vm1743_vm1, 1, %v2809_v40  ;;  %vm1765_vm4 = vc.u32 %v1757_v28, %v1761_v33 }
  0xd0   :  { %v1746_v30 = vadd.s32 %v1744_v27, %v1738_v22  ;;  %vm1747_vm2 = vc.u32 %v1745_v24, %v1741_v21  ;;  %v1767_v45 = vadd.s32 %v1761_v33, %v1757_v28  ;;  %v1766_v48 = vsel %vm1765_vm4, 1, %v2809_v40 }
  0xd1   :  { %v1633_v20 = vsel %vm1631_vm0, %v1632_v10, %v1630_v5  ;;  %v1748_v37 = vsel %vm1747_vm2, 1, %v2809_v40  ;;  %v1719_v34 = vsel %vm1717_vm13, %v3478_v36, 2102212464  ;;  %v1742_v57 = vshrl.u32 %v1737_v8, 16 }
  0xd2   :  { %v1634_v23 = vclz %v1633_v20  ;;  %v1750_v41 = vadd.s32 %v1748_v37, %v1746_v30  ;;  %v1768_v58 = vadd.s32 %v1766_v48, %v1760_v38  ;;  %vm1769_vm5 = vc.u32 %v1767_v45, %v1763_v47 }
  0xd3   :  { %v1840_v60 = vshrl.u32 %v1839_v49, 23  ;;  %v1770_v0 = vsel %vm1769_vm5, 1, %v2809_v40  ;;  %v1720_v1 = vsel %vm1716_vm14, %v3476_v35, %v1719_v34  ;;  %v1762_v2 = vshrl.u32 %v1758_v3, 16 }
  0xd4   :  { %v2773_v17 = vadd.s32 4294967294, %v1634_v23  ;;  %v1751_v55 = vadd.s32 %v1750_v41, %v1740_v13  ;;  %v1772_v4 = vadd.s32 %v1770_v0, %v1768_v58  ;;  %v1836_v8 = vand.u32 2147483647, %v3511_v15 }
  0xd5   :  { %v2778_v6 = vadd.s32 4294967169, %v1840_v60  ;;  %v1652_v10 = vsub.s32 4, %v3494_v52  ;;  %vm1530_vm6 = vcmp.lt.s32.totalorder %v3392_v25, 0  ;;  %v1721_v35 = vsel %vm1715_vm15, %v1718_v11, %v1720_v1 }
  0xd6   :  { %vm2774_vm3 = vcmp.lt.s32.totalorder %v2773_v17, 0  ;;  %v3529_v36 = vadd.s32 %v1751_v55, %v1742_v57  ;;  %v1773_v14 = vadd.s32 %v1772_v4, %v1762_v2  ;;  %v1843_v26 = vand.u32 8388607, %v1836_v8  ;;  %v629_v4 = vpop.f32.mrf.mxu2 }
  0xd7   :  { %v1637_v18 = vsel %vm2774_vm3, 0, %v2773_v17  ;;  %v1846_v42 = vadd.s32 1, %v2778_v6  ;;  %v1653_v24 = vsel %vm1530_vm6, %v1652_v10, %v3494_v52  ;;  %v1775_v16 = vmul.u32 %v3480_v39, %v1721_v35  ;;  %v670_v6 = vpop.f32.mrf.mxu3 }
  0xd8   :  { %v1638_v51 = vsub.s32 32, %v1637_v18  ;;  %v1642_v54 = vsub.s32 4294967266, %v1637_v18  ;;  %v1639_v61 = vshll.u32 %v1630_v5, %v1637_v18  ;;  %v1764_v5 = vshrl.u32 %v1759_v29, 16 }
  0xd9   :  { %vm1847_vm7 = vcmp.gt.s32.totalorder %v1846_v42, 0  ;;  %vm3548_vm9 = vcmp.le.f32.partialorder %v1528_v32, 0.7853982  ;;  %v1844_v13 = vor.u32 8388608, %v1843_v26  ;;  %vm1671_vm2 = vweird.f32 %v3392_v25 }
  0xda   :  { %v1640_v62 = vshrl.u32 %v1622_v19, %v1638_v51  ;;  %v1643_v63 = vadd.s32 127, %v1642_v54  ;;  %v3533_v19 = vadd.s32 %v1767_v45, %v1763_v47  ;;  %v1774_v20 = vadd.s32 %v1773_v14, %v1764_v5 }
  0xdb   :  { %v1848_v23 = vsel %vm1847_vm7, %v1846_v42, 0  ;;  %v1655_v52 = vsel %vm3548_vm9, 0, %v1653_v24  ;;  %v3594_v10 = vshll.u32 %v1844_v13, 8  ;;  %vm1684_vm5 = vcmp.lt.s32.totalorder %v3428_v12, 0 }
  0xdc   :  { %v1641_v7 = vor.u32 %v1640_v62, %v1639_v61  ;;  %v1644_v9 = vshll.u32 %v1643_v63, 23  ;;  %vm1777_vm8 = vc.u32 %v3529_v36, %v3533_v19  ;;  %v1778_v3 = vadd.s32 1, %v1774_v20 }
  0xdd   :  { %v1850_v27 = vand.u32 31, %v1848_v23  ;;  %v3556_v37 = vshrl.u32 %v1848_v23, 5  ;;  %v3588_v1 = vand.u32 3, %v1655_v52  ;;  %v1886_v13 = vshrl.u32 %v3594_v10, 16 }
  0xde   :  { %v1645_v44 = vor.u32 4788187, %v1644_v9  ;;  %v1648_v21 = vcvt.s32.f32 %v1641_v7  ;;  %v1779_v17 = vsel %vm1777_vm8, %v1778_v3, %v1774_v20  ;;  %v671_v20 = vadd.f32 %v670_v6, %v629_v4 }
  0xdf   :  { %v3552_v30 = vsub.s32 32, %v1850_v27  ;;  %v1780_v11 = vadd.s32 %v1779_v17, %v1775_v16  ;;  %v1853_v45 = vshll.u32 %v2803_v43, %v1850_v27  ;;  %v1856_v48 = vshll.u32 %v2804_v46, %v1850_v27  ;;  %v700_v17 = vpop.f32.mrf.mxu0 }
  0xe0   :  { %v1646_v22 = vand.u32 2147483647, %v1645_v44  ;;  %v1862_v51 = vshll.u32 %v2806_v53, %v1850_v27  ;;  %v1859_v55 = vshll.u32 %v2805_v50, %v1850_v27  ;;  %v1865_v62 = vshll.u32 %v2807_v56, %v1850_v27 }
  0xe1   :  { %v1854_v39 = vshrl.u32 %v2804_v46, %v3552_v30  ;;  %v1857_v32 = vshrl.u32 %v2805_v50, %v3552_v30  ;;  %v1781_v41 = vadd.s32 536870912, %v1780_v11  ;;  %v1863_v18 = vshrl.u32 %v2807_v56, %v3552_v30 }
  0xe2   :  { %v1649_v28 = vmul.f32 %v1648_v21, %v1646_v22  ;;  %v1860_v49 = vshrl.u32 %v2806_v53, %v3552_v30  ;;  %v1866_v57 = vshrl.u32 %v2808_v59, %v3552_v30  ;;  %vm1868_vm10 = vcmp.lt.s32.totalorder %v3556_v37, 1 }
  0xe3   :  { %v3578_v34 = vshrl.u32 %v1781_v41, 30  ;;  %v3583_v58 = vor.u32 %v1854_v39, %v1853_v45  ;;  %v3585_v60 = vor.u32 %v1857_v32, %v1856_v48  ;;  %v1864_v61 = vor.u32 %v1863_v18, %v1862_v51  ;;  %v727_v45 = vpop.f32.mrf.mxu1 }
  0xe4   :  { %v1650_v33 = vxor.u32 2147483648, %v1649_v28  ;;  %v3591_v7 = vor.u32 %v1860_v49, %v1859_v55  ;;  %v1867_v9 = vor.u32 %v1866_v57, %v1865_v62  ;;  %vm1871_vm11 = vcmp.lt.s32.totalorder %v3556_v37, 4 }
  0xe5   :  { %v1783_v2 = vshll.u32 %v3578_v34, 30  ;;  %vm1870_vm12 = vcmp.lt.s32.totalorder %v3556_v37, 3  ;;  %v1876_v44 = vsel %vm1868_vm10, %v3583_v58, %v3585_v60  ;;  %v1877_v35 = vsel %vm1871_vm11, %v1864_v61, 920167782 }
  0xe6   :  { %v1651_v38 = vsel %vm1530_vm6, %v1650_v33, %v1649_v28  ;;  %vm1869_vm14 = vcmp.lt.s32.totalorder %v3556_v37, 2  ;;  %v1878_v24 = vsel %vm1870_vm12, %v3591_v7, %v1877_v35  ;;  %v1880_v3 = vsel %vm1868_vm10, %v3585_v60, %v3591_v7 }
  0xe7   :  { %v3570_v47 = vsel %vm3548_vm9, %v3392_v25, %v1651_v38  ;;  %v3596_v42 = vsub.s32 %v1780_v11, %v1783_v2  ;;  %v1881_v26 = vsel %vm1871_vm11, %v1867_v9, 1326507024  ;;  %v3621_v29 = vsel %vm1869_vm14, %v1876_v44, %v1878_v24 }
  0xe8   :  { %v1656_v54 = vmul.f32 %v3570_v47, %v3570_v47  ;;  %vm1674_vm15 = vcmp.eq.s32.totalorder %v3588_v1, 0  ;;  %vm1677_vm0 = vcmp.eq.s32.totalorder %v3588_v1, 2  ;;  %v1776_v33 = vadd.s32 %v3533_v19, %v3529_v36 }
  0xe9   :  { %vm1785_vm13 = vcmp.lt.s32.totalorder %v3596_v42, 0  ;;  %v1786_v23 = vsub.s32 0, %v3596_v42  ;;  %v1885_v11 = vand.u32 65535, %v3594_v10  ;;  %vm1673_vm1 = vcmp.lt.s32.totalorder %v3588_v1, 2 }
  0xea   :  { %v1657_v63 = vmul.f32 -0.001358992, %v1656_v54  ;;  %v1664_v0 = vmul.f32 -0.00019511016, %v1656_v54  ;;  %v1882_v38 = vsel %vm1870_vm12, %v1864_v61, %v1881_v26  ;;  %v1909_v41 = vand.u32 65535, %v3621_v29 }
  0xeb   :  { %v1787_v16 = vsel %vm1785_vm13, %v1786_v23, %v3596_v42  ;;  %v1883_v36 = vsel %vm1869_vm14, %v1880_v3, %v1882_v38  ;;  %v1910_v19 = vshrl.u32 %v3621_v29, 16  ;;  %v701_v48 = vadd.f32 %v700_v17, %v671_v20 }
  0xec   :  { %v1658_v5 = vadd.f32 0.041655596, %v1657_v63  ;;  %v1665_v14 = vadd.f32 0.008332121, %v1664_v0  ;;  %v1788_v52 = vclz %v1787_v16  ;;  %v1888_v55 = vshrl.u32 %v1883_v36, 16  ;;  %v760_v63 = vpop.f32.mrf.mxu2 }
  0xed   :  { %v1806_v57 = vsub.s32 4, %v3578_v34  ;;  %v3640_v61 = vshrl.u32 %v2803_v43, %v3552_v30  ;;  %v728_v62 = vadd.f32 %v727_v45, %v701_v48  ;;  %v1911_v6 = vmul.u32 %v1909_v41, %v1885_v11  ;;  %v855_v45 = vpop.f32.mrf.mxu1 }
  0xee   :  { %v1659_v22 = vmul.f32 %v1658_v5, %v1656_v54  ;;  %v1666_v21 = vmul.f32 %v1665_v14, %v1656_v54  ;;  %v2776_v18 = vadd.s32 4294967294, %v1788_v52  ;;  %v1890_v14 = vmul.u32 %v1888_v55, %v1885_v11  ;;  %v785_v52 = vpop.f32.mrf.mxu3 }
  0xef   :  { %v3643_v44 = vmul.u32 %v1910_v19, %v1885_v11  ;;  %vm3683_vm9 = vcmp.le.f32.partialorder %v1682_v31, 0.7853982  ;;  %vm1825_vm13 = vweird.f32 %v3428_v12 }
  0xf0   :  { %v1660_v27 = vadd.f32 -0.4999988, %v1659_v22  ;;  %v1667_v28 = vadd.f32 -0.16666654, %v1666_v21  ;;  %vm2777_vm3 = vcmp.lt.s32.totalorder %v2776_v18, 0  ;;  %v3645_v21 = vmul.u32 %v1909_v41, %v1886_v13 }
  0xf1   :  { %v1791_v4 = vsel %vm2777_vm3, 0, %v2776_v18  ;;  %v1893_v3 = vshll.u32 %v1890_v14, 16  ;;  %v1914_v41 = vmul.u32 %v1910_v19, %v1886_v13 }
  0xf2   :  { %v1661_v39 = vmul.f32 %v1660_v27, %v1656_v54  ;;  %v1668_v32 = vmul.f32 %v1667_v28, %v1656_v54  ;;  %v1887_v54 = vand.u32 65535, %v1883_v36  ;;  %v1792_v9 = vsub.s32 32, %v1791_v4 }
  0xf3   :  { %v1796_v5 = vsub.s32 4294967266, %v1791_v4  ;;  %v1793_v30 = vshll.u32 %v3596_v42, %v1791_v4  ;;  %v1892_v27 = vmul.u32 %v1888_v55, %v1886_v13  ;;  %v1917_v25 = vshll.u32 %v3645_v21, 16 }
  0xf4   :  { %v1662_v49 = vadd.f32 1.0, %v1661_v39  ;;  %v1669_v51 = vadd.f32 1.0, %v1668_v32  ;;  %v1889_v20 = vmul.u32 %v1887_v54, %v1885_v11  ;;  %v1891_v22 = vmul.u32 %v1887_v54, %v1886_v13  ;;  %v814_v54 = vpop.f32.mrf.mxu0  ;;  %v885_v55 = vpop.f32.mrf.mxu2 }
  0xf5   :  { %v1794_v23 = vshrl.u32 %v1776_v33, %v1792_v9  ;;  %v1797_v24 = vadd.s32 127, %v1796_v5  ;;  %v1915_v39 = vshll.u32 %v3643_v44, 16  ;;  %v1894_v32 = vshrl.u32 %v1890_v14, 16 }
  0xf6   :  { %v1670_v0 = vmul.f32 %v1669_v51, %v3570_v47  ;;  %v1678_v2 = vxor.u32 2147483648, %v1662_v49  ;;  %v1895_v28 = vshll.u32 %v1891_v22, 16  ;;  %vm1897_vm4 = vc.u32 %v1889_v20, %v1893_v3 }
  0xf7   :  { %v1795_v29 = vor.u32 %v1794_v23, %v1793_v30  ;;  %v1798_v17 = vshll.u32 %v1797_v24, 23  ;;  %v1898_v33 = vsel %vm1897_vm4, 1, %v2809_v40  ;;  %v1899_v11 = vadd.s32 %v1893_v3, %v1889_v20 }
  0xf8   :  { %v1675_v35 = vxor.u32 2147483648, %v1670_v0  ;;  %v1679_v26 = vsel %vm1677_vm0, %v1678_v2, %v1670_v0  ;;  %v1900_v38 = vadd.s32 %v1898_v33, %v1892_v27  ;;  %vm1919_vm7 = vc.u32 %v1911_v6, %v1915_v39 }
  0xf9   :  { %v1799_v1 = vor.u32 4788187, %v1798_v17  ;;  %v1802_v18 = vcvt.s32.f32 %v1795_v29  ;;  %vm1901_vm6 = vc.u32 %v1899_v11, %v1895_v28  ;;  %v1921_v51 = vadd.s32 %v1915_v39, %v1911_v6 }
  0xfa   :  { %v1676_v47 = vsel %vm1674_vm15, %v1662_v49, %v1675_v35  ;;  %v1902_v48 = vsel %vm1901_vm6, 1, %v2809_v40  ;;  %v1920_v49 = vsel %vm1919_vm7, 1, %v2809_v40  ;;  %v761_v4 = vadd.f32 %v760_v63, %v728_v62 }
  0xfb   :  { %v1680_v16 = vsel %vm1673_vm1, %v1676_v47, %v1679_v26  ;;  %v1800_v36 = vand.u32 2147483647, %v1799_v1  ;;  %v1904_v0 = vadd.s32 %v1902_v48, %v1900_v38  ;;  %v1922_v2 = vadd.s32 %v1920_v49, %v1914_v41  ;;  %v912_v26 = vpop.f32.mrf.mxu3 }
  0xfc   :  { %v1681_v42 = vsel %vm1671_vm2, nan, %v1680_v16  ;;  %v856_v9 = vadd.f32 %v855_v45, %v814_v54  ;;  %v1873_v13 = vsel %vm1871_vm11, %v3591_v7, 2102212464  ;;  %v1896_v19 = vshrl.u32 %v1891_v22, 16 }
  0xfd   :  { %2760 = vst [vmem:[%s4257_s2] sm:$0xff] %v1681_v42  ;;  %v1803_v5 = vmul.f32 %v1802_v18, %v1800_v36  ;;  %vm1923_vm8 = vc.u32 %v1921_v51, %v1917_v25  ;;  %v1905_v14 = vadd.s32 %v1904_v0, %v1894_v32  ;;  %v3669_v20 = vadd.f32 %v785_v52, %v761_v4  ;;  %v970_v36 = vpop.f32.mrf.mxu1 }
  0xfe   :  { %v1924_v35 = vsel %vm1923_vm8, 1, %v2809_v40  ;;  %v886_v30 = vadd.f32 %v885_v55, %v856_v9  ;;  %v1872_v62 = vsel %vm1868_vm10, %v3640_v61, %v3583_v58  ;;  %v1916_v63 = vshrl.u32 %v3643_v44, 16 }
  0xff   :  { %v1804_v6 = vxor.u32 2147483648, %v1803_v5  ;;  %v1926_v23 = vadd.s32 %v1924_v35, %v1922_v2  ;;  %v1874_v7 = vsel %vm1870_vm12, %v3585_v60, %v1873_v13  ;;  %v1906_v22 = vadd.s32 %v1905_v14, %v1896_v19 }
 0x100   :  { %v1990_v24 = vand.u32 2147483647, %v3669_v20  ;;  %v1993_v3 = vand.u32 2139095040, %v3669_v20  ;;  %v1918_v61 = vshrl.u32 %v3645_v21, 16  ;;  %v1807_v60 = vsel %vm1684_vm5, %v1806_v57, %v3578_v34  ;;  %v945_v57 = vpop.f32.mrf.mxu0 }
 0x101   :  { %v1805_v58 = vsel %vm1684_vm5, %v1804_v6, %v1803_v5  ;;  %v1927_v44 = vadd.s32 %v1926_v23, %v1916_v63  ;;  %v1925_v27 = vadd.s32 %v1921_v51, %v1917_v25  ;;  %v913_v28 = vadd.f32 %v912_v26, %v886_v30 }
 0x102   :  { %v1808_v31 = vsel %vm3683_vm9, %v3428_v12, %v1805_v58  ;;  %v1875_v29 = vsel %vm1869_vm14, %v1872_v62, %v1874_v7  ;;  %v1994_v21 = vshrl.u32 %v1993_v3, 23  ;;  %v1997_v52 = vand.u32 8388607, %v1990_v24 }
 0x103   :  { %v1810_v16 = vmul.f32 %v1808_v31, %v1808_v31  ;;  %v1928_v17 = vadd.s32 %v1927_v44, %v1918_v61  ;;  %vm1931_vm10 = vc.u32 %v1906_v22, %v1925_v27  ;;  %v1809_v39 = vsel %vm3683_vm9, 0, %v1807_v60 }
 0x104   :  { %v2781_v34 = vadd.s32 4294967169, %v1994_v21  ;;  %v1929_v1 = vmul.u32 %v3594_v10, %v1875_v29  ;;  %v946_v32 = vadd.f32 %v945_v57, %v913_v28  ;;  %v1998_v25 = vor.u32 8388608, %v1997_v52 }
 0x105   :  { %v1811_v42 = vmul.f32 -0.001358992, %v1810_v16  ;;  %v1818_v33 = vmul.f32 -0.00019511016, %v1810_v16  ;;  %v1932_v11 = vadd.s32 1, %v1928_v17  ;;  %v1826_v51 = vand.u32 3, %v1809_v39 }
 0x106   :  { %v2000_v45 = vadd.s32 1, %v2781_v34  ;;  %v3705_v9 = vadd.f32 %v970_v36, %v946_v32  ;;  %v3709_v5 = vshll.u32 %v1998_v25, 8  ;;  %v1930_v35 = vadd.s32 %v1925_v27, %v1906_v22 }
 0x107   :  { %v1812_v38 = vadd.f32 0.041655596, %v1811_v42  ;;  %v1819_v37 = vadd.f32 0.008332121, %v1818_v33  ;;  %v1933_v41 = vsel %vm1931_vm10, %v1932_v11, %v1928_v17  ;;  %vm1827_vm12 = vcmp.lt.s32.totalorder %v1826_v51, 2 }
 0x108   :  { %v1934_v18 = vadd.s32 %v1933_v41, %v1929_v1  ;;  %vm2001_vm11 = vcmp.gt.s32.totalorder %v2000_v45, 0  ;;  %vm1828_vm14 = vcmp.eq.s32.totalorder %v1826_v51, 0  ;;  %vm1831_vm15 = vcmp.eq.s32.totalorder %v1826_v51, 2 }
 0x109   :  { %v1813_v48 = vmul.f32 %v1812_v38, %v1810_v16  ;;  %v1820_v49 = vmul.f32 %v1819_v37, %v1810_v16  ;;  %v2002_v55 = vsel %vm2001_vm11, %v2000_v45, 0  ;;  %v2144_v63 = vand.u32 2147483647, %v3705_v9 }
 0x10a   :  { %v1935_v54 = vadd.s32 536870912, %v1934_v18  ;;  %v2004_v4 = vand.u32 31, %v2002_v55  ;;  %v2147_v23 = vand.u32 2139095040, %v3705_v9  ;;  %v3720_v58 = vand.u32 65535, %v3709_v5 }
 0x10b   :  { %v1814_v0 = vadd.f32 -0.4999988, %v1813_v48  ;;  %v1821_v2 = vadd.f32 -0.16666654, %v1820_v49  ;;  %v3724_v26 = vshrl.u32 %v3709_v5, 16  ;;  %v2003_v29 = vshrl.u32 %v2002_v55, 5 }
 0x10c   :  { %v3707_v10 = vshrl.u32 %v1935_v54, 30  ;;  %v2005_v14 = vsub.s32 32, %v2004_v4  ;;  %v2007_v22 = vshll.u32 %v2803_v43, %v2004_v4  ;;  %v2010_v27 = vshll.u32 %v2804_v46, %v2004_v4 }
 0x10d   :  { %v1815_v13 = vmul.f32 %v1814_v0, %v1810_v16  ;;  %v1822_v19 = vmul.f32 %v1821_v2, %v1810_v16  ;;  %v2013_v17 = vshll.u32 %v2805_v50, %v2004_v4  ;;  %v2148_v21 = vshrl.u32 %v2147_v23, 23 }
 0x10e   :  { %v1937_v30 = vshll.u32 %v3707_v10, 30  ;;  %v2008_v3 = vshrl.u32 %v2804_v46, %v2005_v14  ;;  %v2011_v47 = vshrl.u32 %v2805_v50, %v2005_v14  ;;  %v2014_v28 = vshrl.u32 %v2806_v53, %v2005_v14 }
 0x10f   :  { %v1816_v6 = vadd.f32 1.0, %v1815_v13  ;;  %v1823_v62 = vadd.f32 1.0, %v1822_v19  ;;  %v2016_v57 = vshll.u32 %v2806_v53, %v2004_v4  ;;  %v2017_v39 = vshrl.u32 %v2807_v56, %v2005_v14 }
 0x110   :  { %v3715_v7 = vsub.s32 %v1934_v18, %v1937_v30  ;;  %v2009_v42 = vor.u32 %v2008_v3, %v2007_v22  ;;  %v2012_v33 = vor.u32 %v2011_v47, %v2010_v27  ;;  %vm1838_vm1 = vcmp.lt.s32.totalorder %v3511_v15, 0 }
 0x111   :  { %v1824_v61 = vmul.f32 %v1823_v62, %v1808_v31  ;;  %v1832_v44 = vxor.u32 2147483648, %v1816_v6  ;;  %v2015_v32 = vor.u32 %v2014_v28, %v2013_v17  ;;  %v2019_v38 = vshll.u32 %v2807_v56, %v2004_v4 }
 0x112   :  { %vm1939_vm0 = vcmp.lt.s32.totalorder %v3715_v7, 0  ;;  %v1940_v60 = vsub.s32 0, %v3715_v7  ;;  %v2020_v37 = vshrl.u32 %v2808_v59, %v2005_v14  ;;  %v1960_v18 = vsub.s32 4, %v3707_v10 }
 0x113   :  { %v1829_v16 = vxor.u32 2147483648, %v1824_v61  ;;  %v1833_v31 = vsel %vm1831_vm15, %v1832_v44, %v1824_v61  ;;  %v2018_v25 = vor.u32 %v2017_v39, %v2016_v57  ;;  %v2006_v36 = vshrl.u32 %v2803_v43, %v2005_v14 }
 0x114   :  { %v1941_v52 = vsel %vm1939_vm0, %v1940_v60, %v3715_v7  ;;  %v2021_v48 = vor.u32 %v2020_v37, %v2019_v38  ;;  %vm2022_vm2 = vcmp.lt.s32.totalorder %v2003_v29, 1  ;;  %vm2025_vm3 = vcmp.lt.s32.totalorder %v2003_v29, 4 }
 0x115   :  { %v1830_v11 = vsel %vm1828_vm14, %v1816_v6, %v1829_v16  ;;  %v1942_v34 = vclz %v1941_v52  ;;  %vm2024_vm5 = vcmp.lt.s32.totalorder %v2003_v29, 3  ;;  %v2030_v49 = vsel %vm2022_vm2, %v2009_v42, %v2012_v33 }
 0x116   :  { %v1834_v1 = vsel %vm1827_vm12, %v1830_v11, %v1833_v31  ;;  %v2031_v51 = vsel %vm2025_vm3, %v2018_v25, 920167782  ;;  %v2034_v55 = vsel %vm2022_vm2, %v2012_v33, %v2015_v32  ;;  %v2035_v0 = vsel %vm2025_vm3, %v2021_v48, 1326507024 }
 0x117   :  { %v1835_v41 = vsel %vm1825_vm13, nan, %v1834_v1  ;;  %v2779_v45 = vadd.s32 4294967294, %v1942_v34  ;;  %v2032_v12 = vsel %vm2024_vm5, %v2015_v32, %v2031_v51  ;;  %vm2023_vm6 = vcmp.lt.s32.totalorder %v2003_v29, 2 }
 0x118   :  { %2761 = vst [vmem:[%s4257_s2 + $0x8] sm:$0xff] %v1835_v41  ;;  %v2027_v13 = vsel %vm2025_vm3, %v2015_v32, 2102212464  ;;  %v2026_v30 = vsel %vm2022_vm2, %v2006_v36, %v2009_v42  ;;  %v2033_v14 = vsel %vm2023_vm6, %v2030_v49, %v2032_v12  ;;  %v2036_v6 = vsel %vm2024_vm5, %v2018_v25, %v2035_v0 }
 0x119   :  { %vm2780_vm4 = vcmp.lt.s32.totalorder %v2779_v45, 0  ;;  %v2037_v3 = vsel %vm2023_vm6, %v2034_v55, %v2036_v6  ;;  %v2063_v47 = vand.u32 65535, %v2033_v14  ;;  %v2028_v61 = vsel %vm2024_vm5, %v2012_v33, %v2027_v13 }
 0x11a   :  { %v1945_v54 = vsel %vm2780_vm4, 0, %v2779_v45  ;;  %v2041_v44 = vand.u32 65535, %v2037_v3  ;;  %v2042_v22 = vshrl.u32 %v2037_v3, 16  ;;  %v2064_v60 = vshrl.u32 %v2033_v14, 16 }
 0x11b   :  { %v1946_v2 = vsub.s32 32, %v1945_v54  ;;  %v1950_v4 = vsub.s32 4294967266, %v1945_v54  ;;  %v1947_v19 = vshll.u32 %v3715_v7, %v1945_v54  ;;  %v3756_v7 = vsel %vm1838_vm1, %v1960_v18, %v3707_v10 }
 0x11c   :  { %v3760_v16 = vand.u32 8388607, %v2144_v63  ;;  %v2045_v17 = vmul.u32 %v2041_v44, %v3724_v26  ;;  %v2067_v31 = vmul.u32 %v2063_v47, %v3724_v26  ;;  %v2784_v52 = vadd.s32 4294967169, %v2148_v21 }
 0x11d   :  { %v1948_v62 = vshrl.u32 %v1930_v35, %v1946_v2  ;;  %v1951_v23 = vadd.s32 127, %v1950_v4  ;;  %v2044_v35 = vmul.u32 %v2042_v22, %v3720_v58  ;;  %vm3767_vm7 = vcmp.le.f32.partialorder %v1836_v8, 0.7853982 }
 0x11e   :  { %v3772_v10 = vsel %vm2023_vm6, %v2026_v30, %v2028_v61  ;;  %v2065_v11 = vmul.u32 %v2063_v47, %v3720_v58  ;;  %v2066_v34 = vmul.u32 %v2064_v60, %v3720_v58  ;;  %v2043_v39 = vmul.u32 %v2041_v44, %v3720_v58 }
 0x11f   :  { %v1949_v27 = vor.u32 %v1948_v62, %v1947_v19  ;;  %v1952_v28 = vshll.u32 %v1951_v23, 23  ;;  %v2046_v1 = vmul.u32 %v2042_v22, %v3724_v26  ;;  %v2047_v21 = vshll.u32 %v2044_v35, 16 }
 0x120   :  { %v2049_v38 = vshll.u32 %v2045_v17, 16  ;;  %v2068_v8 = vmul.u32 %v2064_v60, %v3724_v26  ;;  %v2069_v37 = vshll.u32 %v2066_v34, 16  ;;  %v2071_v29 = vshll.u32 %v2067_v31, 16 }
 0x121   :  { %v1953_v33 = vor.u32 4788187, %v1952_v28  ;;  %v1956_v57 = vcvt.s32.f32 %v1949_v27  ;;  %vm2051_vm8 = vc.u32 %v2043_v39, %v2047_v21  ;;  %v2053_v41 = vadd.s32 %v2047_v21, %v2043_v39 }
 0x122   :  { %v2154_v45 = vadd.s32 1, %v2784_v52  ;;  %v2052_v25 = vsel %vm2051_vm8, 1, %v2809_v40  ;;  %vm2073_vm9 = vc.u32 %v2065_v11, %v2069_v37  ;;  %v2075_v36 = vadd.s32 %v2069_v37, %v2065_v11 }
 0x123   :  { %v1954_v32 = vand.u32 2147483647, %v1953_v33  ;;  %v2054_v48 = vadd.s32 %v2052_v25, %v2046_v1  ;;  %vm2055_vm10 = vc.u32 %v2053_v41, %v2049_v38  ;;  %v2074_v58 = vsel %vm2073_vm9, 1, %v2809_v40 }
 0x124   :  { %vm2155_vm11 = vcmp.gt.s32.totalorder %v2154_v45, 0  ;;  %v2056_v51 = vsel %vm2055_vm10, 1, %v2809_v40  ;;  %v2076_v54 = vadd.s32 %v2074_v58, %v2068_v8  ;;  %vm2077_vm12 = vc.u32 %v2075_v36, %v2071_v29 }
 0x125   :  { %v1957_v18 = vmul.f32 %v1956_v57, %v1954_v32  ;;  %v2048_v26 = vshrl.u32 %v2044_v35, 16  ;;  %v2058_v12 = vadd.s32 %v2056_v51, %v2054_v48  ;;  %v2078_v55 = vsel %vm2077_vm12, 1, %v2809_v40 }
 0x126   :  { %v2156_v0 = vsel %vm2155_vm11, %v2154_v45, 0  ;;  %v2070_v4 = vshrl.u32 %v2066_v34, 16  ;;  %v2080_v13 = vadd.s32 %v2078_v55, %v2076_v54  ;;  %v2050_v14 = vshrl.u32 %v2045_v17, 16 }
 0x127   :  { %v1958_v49 = vxor.u32 2147483648, %v1957_v18  ;;  %v2158_v19 = vand.u32 31, %v2156_v0  ;;  %v2059_v6 = vadd.s32 %v2058_v12, %v2048_v26  ;;  %v2072_v23 = vshrl.u32 %v2067_v31, 16 }
 0x128   :  { %v2081_v3 = vadd.s32 %v2080_v13, %v2070_v4  ;;  %v1963_v61 = vsel %vm3767_vm7, 0, %v3756_v7  ;;  %v3795_v22 = vadd.s32 %v2075_v36, %v2071_v29  ;;  %v2083_v60 = vmul.u32 %v3709_v5, %v3772_v10 }
 0x129   :  { %v1959_v2 = vsel %vm1838_vm1, %v1958_v49, %v1957_v18  ;;  %v3788_v47 = vsub.s32 32, %v2158_v19  ;;  %v3793_v44 = vadd.s32 %v2059_v6, %v2050_v14  ;;  %v2152_v17 = vor.u32 8388608, %v3760_v16  ;;  %v3823_v49 = vpop.f32.mrf.mxu2 }
 0x12a   :  { %v1962_v30 = vsel %vm3767_vm7, %v3511_v15, %v1959_v2  ;;  %v2082_v35 = vadd.s32 %v2081_v3, %v2072_v23  ;;  %v3802_v31 = vshrl.u32 %v2156_v0, 5  ;;  %v2161_v52 = vshll.u32 %v2803_v43, %v2158_v19  ;;  %v1040_v23 = vpop.f32.mrf.mxu3 }
 0x12b   :  { %v1964_v62 = vmul.f32 %v1962_v30, %v1962_v30  ;;  %vm2085_vm13 = vc.u32 %v3793_v44, %v3795_v22  ;;  %v2165_v7 = vshrl.u32 %v2805_v50, %v3788_v47  ;;  %v2168_v5 = vshrl.u32 %v2806_v53, %v3788_v47 }
 0x12c   :  { %v2086_v11 = vadd.s32 1, %v2082_v35  ;;  %v2162_v10 = vshrl.u32 %v2804_v46, %v3788_v47  ;;  %v2164_v16 = vshll.u32 %v2804_v46, %v2158_v19  ;;  %v2170_v34 = vshll.u32 %v2806_v53, %v2158_v19 }
 0x12d   :  { %v1965_v27 = vmul.f32 -0.001358992, %v1964_v62  ;;  %v1972_v28 = vmul.f32 -0.00019511016, %v1964_v62  ;;  %v2171_v57 = vshrl.u32 %v2807_v56, %v3788_v47  ;;  %v2167_v32 = vshll.u32 %v2805_v50, %v2158_v19 }
 0x12e   :  { %v2087_v21 = vsel %vm2085_vm13, %v2086_v11, %v2082_v35  ;;  %v2173_v37 = vshll.u32 %v2807_v56, %v2158_v19  ;;  %v2174_v41 = vshrl.u32 %v2808_v59, %v3788_v47  ;;  %v3819_v18 = vor.u32 %v2165_v7, %v2164_v16  ;;  %v1070_v35 = vpop.f32.mrf.mxu0  ;;  %v3856_v7 = vpop.f32.mrf.mxu1 }
 0x12f   :  { %v1966_v42 = vadd.f32 0.041655596, %v1965_v27  ;;  %v1973_v33 = vadd.f32 0.008332121, %v1972_v28  ;;  %v2088_v38 = vadd.s32 %v2087_v21, %v2083_v60  ;;  %v2172_v8 = vor.u32 %v2171_v57, %v2170_v34 }
 0x130   :  { %v2169_v25 = vor.u32 %v2168_v5, %v2167_v32  ;;  %v3821_v48 = vor.u32 %v2162_v10, %v2161_v52  ;;  %v2175_v58 = vor.u32 %v2174_v41, %v2173_v37  ;;  %v1980_v26 = vand.u32 3, %v1963_v61 }
 0x131   :  { %v1967_v39 = vmul.f32 %v1966_v42, %v1964_v62  ;;  %v1974_v1 = vmul.f32 %v1973_v33, %v1964_v62  ;;  %v2089_v36 = vadd.s32 536870912, %v2088_v38  ;;  %vm2179_vm14 = vcmp.lt.s32.totalorder %v3802_v31, 4  ;;  %v1130_v21 = vpop.f32.mrf.mxu2 }
 0x132   :  { %vm2176_vm15 = vcmp.lt.s32.totalorder %v3802_v31, 1  ;;  %v2185_v55 = vsel %vm2179_vm14, %v2172_v8, 920167782  ;;  %v3831_v0 = vshll.u32 %v2152_v17, 8  ;;  %vm2178_vm0 = vcmp.lt.s32.totalorder %v3802_v31, 3 }
 0x133   :  { %v1968_v29 = vadd.f32 -0.4999988, %v1967_v39  ;;  %v1975_v45 = vadd.f32 -0.16666654, %v1974_v1  ;;  %v3826_v12 = vshrl.u32 %v2089_v36, 30  ;;  %v2188_v13 = vsel %vm2176_vm15, %v3819_v18, %v2169_v25 }
 0x134   :  { %v2184_v14 = vsel %vm2176_vm15, %v3821_v48, %v3819_v18  ;;  %v2186_v6 = vsel %vm2178_vm0, %v2169_v25, %v2185_v55  ;;  %vm2177_vm1 = vcmp.lt.s32.totalorder %v3802_v31, 2  ;;  %vm1979_vm2 = vweird.f32 %v3511_v15 }
 0x135   :  { %v1969_v51 = vmul.f32 %v1968_v29, %v1964_v62  ;;  %v1976_v54 = vmul.f32 %v1975_v45, %v1964_v62  ;;  %v2091_v19 = vshll.u32 %v3826_v12, 30  ;;  %v2189_v62 = vsel %vm2179_vm14, %v2175_v58, 1326507024 }
 0x136   :  { %v2190_v60 = vsel %vm2178_vm0, %v2172_v8, %v2189_v62  ;;  %vm1982_vm3 = vcmp.eq.s32.totalorder %v1980_v26, 0  ;;  %vm1985_vm4 = vcmp.eq.s32.totalorder %v1980_v26, 2  ;;  %v2194_v33 = vshrl.u32 %v3831_v0, 16 }
 0x137   :  { %v1970_v2 = vadd.f32 1.0, %v1969_v51  ;;  %v1977_v4 = vadd.f32 1.0, %v1976_v54  ;;  %v3850_v27 = vsub.s32 %v2088_v38, %v2091_v19  ;;  %v2191_v28 = vsel %vm2177_vm1, %v2188_v13, %v2190_v60  ;;  %v1225_v60 = vpop.f32.mrf.mxu1 }
 0x138   :  { %v2195_v52 = vand.u32 65535, %v2191_v28  ;;  %v2196_v11 = vshrl.u32 %v2191_v28, 16  ;;  %vm1981_vm6 = vcmp.lt.s32.totalorder %v1980_v26, 2  ;;  %v2193_v16 = vand.u32 65535, %v3831_v0 }
 0x139   :  { %v1978_v3 = vmul.f32 %v1977_v4, %v1962_v30  ;;  %v1986_v61 = vxor.u32 2147483648, %v1970_v2  ;;  %v2187_v30 = vsel %vm2177_vm1, %v2184_v14, %v2186_v6  ;;  %vm2093_vm5 = vcmp.lt.s32.totalorder %v3850_v27, 0  ;;  %v1155_v4 = vpop.f32.mrf.mxu3  ;;  %v1184_v14 = vpop.f32.mrf.mxu0 }
 0x13a   :  { %v2094_v42 = vsub.s32 0, %v3850_v27  ;;  %v3863_v39 = vmul.u32 %v2195_v52, %v2194_v33  ;;  %v2217_v1 = vand.u32 65535, %v2187_v30  ;;  %v2198_v8 = vmul.u32 %v2196_v11, %v2193_v16 }
 0x13b   :  { %v1983_v17 = vxor.u32 2147483648, %v1978_v3  ;;  %v1987_v10 = vsel %vm1985_vm4, %v1986_v61, %v1978_v3  ;;  %v2084_v37 = vadd.s32 %v3795_v22, %v3793_v44  ;;  %v2160_v41 = vshrl.u32 %v2803_v43, %v3788_v47 }
 0x13c   :  { %v2095_v57 = vsel %vm2093_vm5, %v2094_v42, %v3850_v27  ;;  %v2181_v29 = vsel %vm2179_vm14, %v2169_v25, 2102212464  ;;  %v2218_v45 = vshrl.u32 %v2187_v30, 16  ;;  %v2197_v58 = vmul.u32 %v2195_v52, %v2193_v16 }
 0x13d   :  { %v1984_v5 = vsel %vm1982_vm3, %v1970_v2, %v1983_v17  ;;  %v2096_v38 = vclz %v2095_v57  ;;  %v2200_v15 = vmul.u32 %v2196_v11, %v2194_v33  ;;  %v2201_v51 = vshll.u32 %v2198_v8, 16 }
 0x13e   :  { %v1988_v34 = vsel %vm1981_vm6, %v1984_v5, %v1987_v10  ;;  %v2202_v54 = vshrl.u32 %v2198_v8, 16  ;;  %v2203_v26 = vshll.u32 %v3863_v39, 16  ;;  %v2220_v55 = vmul.u32 %v2218_v45, %v2193_v16 }
 0x13f   :  { %v1989_v32 = vsel %vm1979_vm2, nan, %v1988_v34  ;;  %v2782_v36 = vadd.s32 4294967294, %v2096_v38  ;;  %v2221_v2 = vmul.u32 %v2217_v1, %v2194_v33  ;;  %vm2205_vm8 = vc.u32 %v2197_v58, %v2201_v51 }
 0x140   :  { %2762 = vst [vmem:[%s4257_s2 + $0x10] sm:$0xff] %v1989_v32  ;;  %v2207_v44 = vadd.s32 %v2201_v51, %v2197_v58  ;;  %v2219_v22 = vmul.u32 %v2217_v1, %v2193_v16  ;;  %v2206_v47 = vsel %vm2205_vm8, 1, %v2809_v40  ;;  %v2223_v19 = vshll.u32 %v2220_v55, 16  ;;  %v1255_v16 = vpop.f32.mrf.mxu2 }
 0x141   :  { %vm2783_vm7 = vcmp.lt.s32.totalorder %v2782_v36, 0  ;;  %v1041_v25 = vadd.f32 %v1040_v23, %v3823_v49  ;;  %v2208_v3 = vadd.s32 %v2206_v47, %v2200_v15  ;;  %v2222_v61 = vmul.u32 %v2218_v45, %v2194_v33 }
 0x142   :  { %v2099_v13 = vsel %vm2783_vm7, 0, %v2782_v36  ;;  %vm2209_vm9 = vc.u32 %v2207_v44, %v2203_v26  ;;  %v2225_v17 = vshll.u32 %v2221_v2, 16  ;;  %vm2227_vm10 = vc.u32 %v2219_v22, %v2223_v19 }
 0x143   :  { %v2100_v6 = vsub.s32 32, %v2099_v13  ;;  %v2104_v62 = vsub.s32 4294967266, %v2099_v13  ;;  %v2101_v28 = vshll.u32 %v3850_v27, %v2099_v13  ;;  %v2210_v42 = vsel %vm2209_vm9, 1, %v2809_v40 }
 0x144   :  { %v2228_v11 = vsel %vm2227_vm10, 1, %v2809_v40  ;;  %v2212_v5 = vadd.s32 %v2210_v42, %v2208_v3  ;;  %v2229_v10 = vadd.s32 %v2223_v19, %v2219_v22  ;;  %v1071_v23 = vadd.f32 %v1070_v35, %v1041_v25  ;;  %v1340_v19 = vpop.f32.mrf.mxu1 }
 0x145   :  { %v2102_v30 = vshrl.u32 %v2084_v37, %v2100_v6  ;;  %v2105_v52 = vadd.s32 127, %v2104_v62  ;;  %v2230_v49 = vadd.s32 %v2228_v11, %v2222_v61  ;;  %v2180_v27 = vsel %vm2176_vm15, %v2160_v41, %v3821_v48  ;;  %v1282_v41 = vpop.f32.mrf.mxu3 }
 0x146   :  { %v1226_v33 = vadd.f32 %v1225_v60, %v1184_v14  ;;  %v2182_v1 = vsel %vm2178_vm0, %v3819_v18, %v2181_v29  ;;  %v2213_v32 = vadd.s32 %v2212_v5, %v2202_v54  ;;  %vm2231_vm11 = vc.u32 %v2229_v10, %v2225_v17 }
 0x147   :  { %v2103_v34 = vor.u32 %v2102_v30, %v2101_v28  ;;  %v2106_v57 = vshll.u32 %v2105_v52, 23  ;;  %v1098_v38 = vadd.f32 %v3856_v7, %v1071_v23  ;;  %v2204_v37 = vshrl.u32 %v3863_v39, 16  ;;  %v1315_v7 = vpop.f32.mrf.mxu0 }
 0x148   :  { %v2232_v35 = vsel %vm2231_vm11, 1, %v2809_v40  ;;  %v1256_v45 = vadd.f32 %v1255_v16, %v1226_v33  ;;  %v2114_v36 = vsub.s32 4, %v3826_v12  ;;  %v2224_v58 = vshrl.u32 %v2220_v55, 16 }
 0x149   :  { %v2107_v8 = vor.u32 4788187, %v2106_v57  ;;  %v2234_v15 = vadd.s32 %v2232_v35, %v2230_v49  ;;  %v1131_v48 = vadd.f32 %v1130_v21, %v1098_v38  ;;  %v2110_v26 = vcvt.s32.f32 %v2103_v34 }
 0x14a   :  { %v2214_v44 = vadd.s32 %v2213_v32, %v2204_v37  ;;  %v1283_v18 = vadd.f32 %v1282_v41, %v1256_v45  ;;  %v2226_v29 = vshrl.u32 %v2221_v2, 16  ;;  %vm1992_vm12 = vcmp.lt.s32.totalorder %v3669_v20, 0 }
 0x14b   :  { %v2108_v51 = vand.u32 2147483647, %v2107_v8  ;;  %v2235_v54 = vadd.s32 %v2234_v15, %v2224_v58  ;;  %v3892_v22 = vadd.f32 %v1155_v4, %v1131_v48  ;;  %v2233_v13 = vadd.s32 %v2229_v10, %v2225_v17 }
 0x14c   :  { %v1316_v47 = vadd.f32 %v1315_v7, %v1283_v18  ;;  %v2183_v55 = vsel %vm2177_vm1, %v2180_v27, %v2182_v1  ;;  %v2115_v2 = vsel %vm1992_vm12, %v2114_v36, %v3826_v12  ;;  %vm1991_vm14 = vcmp.le.f32.partialorder %v1990_v24, 0.7853982 }
 0x14d   :  { %v2111_v39 = vmul.f32 %v2110_v26, %v2108_v51  ;;  %v2236_v21 = vadd.s32 %v2235_v54, %v2226_v29  ;;  %v2298_v25 = vand.u32 2147483647, %v3892_v22  ;;  %v2301_v14 = vand.u32 2139095040, %v3892_v22 }
 0x14e   :  { %vm2239_vm13 = vc.u32 %v2214_v44, %v2233_v13  ;;  %v3904_v61 = vadd.f32 %v1340_v19, %v1316_v47  ;;  %v2237_v60 = vmul.u32 %v3831_v0, %v2183_v55  ;;  %v2117_v30 = vsel %vm1991_vm14, 0, %v2115_v2 }
 0x14f   :  { %v2112_v6 = vxor.u32 2147483648, %v2111_v39  ;;  %v2240_v4 = vadd.s32 1, %v2236_v21  ;;  %v2302_v62 = vshrl.u32 %v2301_v14, 23  ;;  %v2305_v3 = vand.u32 8388607, %v2298_v25 }
 0x150   :  { %v2455_v10 = vand.u32 2139095040, %v3904_v61  ;;  %v3913_v24 = vand.u32 3, %v2117_v30  ;;  %v2238_v35 = vadd.s32 %v2233_v13, %v2214_v44  ;;  %v2452_v48 = vand.u32 2147483647, %v3904_v61 }
 0x151   :  { %v2113_v31 = vsel %vm1992_vm12, %v2112_v6, %v2111_v39  ;;  %v2241_v17 = vsel %vm2239_vm13, %v2240_v4, %v2236_v21  ;;  %v2787_v12 = vadd.s32 4294967169, %v2302_v62  ;;  %v2306_v11 = vor.u32 8388608, %v2305_v3 }
 0x152   :  { %v2116_v28 = vsel %vm1991_vm14, %v3669_v20, %v2113_v31  ;;  %v2242_v42 = vadd.s32 %v2241_v17, %v2237_v60  ;;  %v2456_v32 = vshrl.u32 %v2455_v10, 23  ;;  %vm2139_vm0 = vcmp.eq.s32.totalorder %v3913_v24, 2 }
 0x153   :  { %v2118_v52 = vmul.f32 %v2116_v28, %v2116_v28  ;;  %v2308_v5 = vadd.s32 1, %v2787_v12  ;;  %v3917_v1 = vshll.u32 %v2306_v11, 8  ;;  %vm2136_vm1 = vcmp.eq.s32.totalorder %v3913_v24, 0 }
 0x154   :  { %v2243_v16 = vadd.s32 536870912, %v2242_v42  ;;  %v3931_v18 = vadd.s32 4294967169, %v2456_v32  ;;  %vm2135_vm2 = vcmp.lt.s32.totalorder %v3913_v24, 2  ;;  %vm2133_vm4 = vweird.f32 %v3669_v20 }
 0x155   :  { %v2119_v49 = vmul.f32 -0.001358992, %v2118_v52  ;;  %v2126_v23 = vmul.f32 -0.00019511016, %v2118_v52  ;;  %vm2309_vm15 = vcmp.gt.s32.totalorder %v2308_v5, 0  ;;  %v3929_v26 = vand.u32 65535, %v3917_v1 }
 0x156   :  { %v3915_v0 = vshrl.u32 %v2243_v16, 30  ;;  %v2310_v27 = vsel %vm2309_vm15, %v2308_v5, 0  ;;  %vm2146_vm6 = vcmp.lt.s32.totalorder %v3705_v9, 0  ;;  %vm3992_vm11 = vcmp.le.f32.partialorder %v2144_v63, 0.7853982 }
 0x157   :  { %v2120_v34 = vadd.f32 0.041655596, %v2119_v49  ;;  %v2127_v57 = vadd.f32 0.008332121, %v2126_v23  ;;  %v2312_v33 = vand.u32 31, %v2310_v27  ;;  %v3925_v41 = vshrl.u32 %v2310_v27, 5 }
 0x158   :  { %v2245_v37 = vshll.u32 %v3915_v0, 30  ;;  %v2268_v7 = vsub.s32 4, %v3915_v0 }
 0x159   :  { %v2121_v38 = vmul.f32 %v2120_v34, %v2118_v52  ;;  %v2128_v8 = vmul.f32 %v2127_v57, %v2118_v52  ;;  %v2313_v45 = vsub.s32 32, %v2312_v33  ;;  %v2315_v39 = vshll.u32 %v2803_v43, %v2312_v33 }
 0x15a   :  { %v3921_v15 = vsub.s32 %v2242_v42, %v2245_v37  ;;  %v2318_v13 = vshll.u32 %v2804_v46, %v2312_v33  ;;  %v2321_v62 = vshll.u32 %v2805_v50, %v2312_v33  ;;  %v2324_v60 = vshll.u32 %v2806_v53, %v2312_v33 }
 0x15b   :  { %v2122_v36 = vadd.f32 -0.4999988, %v2121_v38  ;;  %v2129_v58 = vadd.f32 -0.16666654, %v2128_v8  ;;  %v2316_v51 = vshrl.u32 %v2804_v46, %v2313_v45  ;;  %v2322_v47 = vshrl.u32 %v2806_v53, %v2313_v45 }
 0x15c   :  { %vm2247_vm3 = vcmp.lt.s32.totalorder %v3921_v15, 0  ;;  %v2248_v54 = vsub.s32 0, %v3921_v15  ;;  %v2319_v14 = vshrl.u32 %v2805_v50, %v2313_v45  ;;  %v2314_v2 = vshrl.u32 %v2803_v43, %v2313_v45 }
 0x15d   :  { %v2123_v44 = vmul.f32 %v2122_v36, %v2118_v52  ;;  %v2130_v29 = vmul.f32 %v2129_v58, %v2118_v52  ;;  %v2317_v4 = vor.u32 %v2316_v51, %v2315_v39  ;;  %v2325_v17 = vshrl.u32 %v2807_v56, %v2313_v45 }
 0x15e   :  { %v2249_v21 = vsel %vm2247_vm3, %v2248_v54, %v3921_v15  ;;  %v2323_v30 = vor.u32 %v2322_v47, %v2321_v62  ;;  %v2327_v52 = vshll.u32 %v2807_v56, %v2312_v33  ;;  %v2328_v42 = vshrl.u32 %v2808_v59, %v2313_v45 }
 0x15f   :  { %v2124_v19 = vadd.f32 1.0, %v2123_v44  ;;  %v2131_v55 = vadd.f32 1.0, %v2130_v29  ;;  %v2250_v6 = vclz %v2249_v21  ;;  %v2320_v5 = vor.u32 %v2319_v14, %v2318_v13 }
 0x160   :  { %v2326_v10 = vor.u32 %v2325_v17, %v2324_v60  ;;  %vm2330_vm5 = vcmp.lt.s32.totalorder %v3925_v41, 1  ;;  %vm2331_vm8 = vcmp.lt.s32.totalorder %v3925_v41, 2  ;;  %vm2332_vm9 = vcmp.lt.s32.totalorder %v3925_v41, 3 }
 0x161   :  { %v2132_v3 = vmul.f32 %v2131_v55, %v2116_v28  ;;  %v2140_v31 = vxor.u32 2147483648, %v2124_v19  ;;  %v2785_v12 = vadd.s32 4294967294, %v2250_v6  ;;  %v2329_v28 = vor.u32 %v2328_v42, %v2327_v52 }
 0x162   :  { %vm2333_vm10 = vcmp.lt.s32.totalorder %v3925_v41, 4  ;;  %v2334_v38 = vsel %vm2330_vm5, %v2314_v2, %v2317_v4  ;;  %v2338_v8 = vsel %vm2330_vm5, %v2317_v4, %v2320_v5  ;;  %v2342_v44 = vsel %vm2330_vm5, %v2320_v5, %v2323_v30 }
 0x163   :  { %v2137_v11 = vxor.u32 2147483648, %v2132_v3  ;;  %v2141_v49 = vsel %vm2139_vm0, %v2140_v31, %v2132_v3  ;;  %vm2786_vm7 = vcmp.lt.s32.totalorder %v2785_v12, 0  ;;  %v2335_v33 = vsel %vm2333_vm10, %v2323_v30, 2102212464 }
 0x164   :  { %v2253_v16 = vsel %vm2786_vm7, 0, %v2785_v12  ;;  %v2339_v37 = vsel %vm2333_vm10, %v2326_v10, 920167782  ;;  %v2336_v58 = vsel %vm2332_vm9, %v2320_v5, %v2335_v33  ;;  %v2343_v29 = vsel %vm2333_vm10, %v2329_v28, 1326507024 }
 0x165   :  { %v2138_v23 = vsel %vm2136_vm1, %v2124_v19, %v2137_v11  ;;  %v2254_v57 = vsub.s32 32, %v2253_v16  ;;  %v2258_v27 = vsub.s32 4294967266, %v2253_v16  ;;  %v2255_v24 = vshll.u32 %v3921_v15, %v2253_v16 }
 0x166   :  { %v2142_v34 = vsel %vm2135_vm2, %v2138_v23, %v2141_v49  ;;  %v2340_v20 = vsel %vm2332_vm9, %v2323_v30, %v2339_v37  ;;  %v2348_v47 = vshrl.u32 %v3917_v1, 16  ;;  %v2462_v55 = vadd.s32 1, %v3931_v18 }
 0x167   :  { %v2143_v32 = vsel %vm2133_vm4, nan, %v2142_v34  ;;  %v2256_v45 = vshrl.u32 %v2238_v35, %v2254_v57  ;;  %v2259_v36 = vadd.s32 127, %v2258_v27  ;;  %v2341_v51 = vsel %vm2331_vm8, %v2338_v8, %v2340_v20 }
 0x168   :  { %2763 = vst [vmem:[%s4257_s2 + $0x18] sm:$0xff] %v2143_v32  ;;  %v2344_v35 = vsel %vm2332_vm9, %v2326_v10, %v2343_v29  ;;  %v2371_v15 = vand.u32 65535, %v2341_v51  ;;  %v2372_v19 = vshrl.u32 %v2341_v51, 16  ;;  %v3998_v4 = vand.u32 8388607, %v2452_v48 }
 0x169   :  { %v2257_v54 = vor.u32 %v2256_v45, %v2255_v24  ;;  %v2260_v39 = vshll.u32 %v2259_v36, 23  ;;  %v2345_v13 = vsel %vm2331_vm8, %v2342_v44, %v2344_v35  ;;  %v4005_v62 = vsel %vm2146_vm6, %v2268_v7, %v3915_v0 }
 0x16a   :  { %v2349_v6 = vand.u32 65535, %v2345_v13  ;;  %v2350_v2 = vshrl.u32 %v2345_v13, 16  ;;  %v4009_v63 = vsel %vm2331_vm8, %v2334_v38, %v2336_v58  ;;  %v2374_v18 = vmul.u32 %v2372_v19, %v3929_v26 }
 0x16b   :  { %v2261_v14 = vor.u32 4788187, %v2260_v39  ;;  %v2375_v3 = vmul.u32 %v2371_v15, %v2348_v47  ;;  %v2264_v60 = vcvt.s32.f32 %v2257_v54  ;;  %v2373_v30 = vmul.u32 %v2371_v15, %v3929_v26 }
 0x16c   :  { %v2352_v17 = vmul.u32 %v2350_v2, %v3929_v26  ;;  %v2353_v12 = vmul.u32 %v2349_v6, %v2348_v47  ;;  %v2376_v52 = vmul.u32 %v2372_v19, %v2348_v47  ;;  %v2377_v42 = vshll.u32 %v2374_v18, 16 }
 0x16d   :  { %v2262_v31 = vand.u32 2147483647, %v2261_v14  ;;  %vm2463_vm12 = vcmp.gt.s32.totalorder %v2462_v55, 0  ;;  %v2351_v0 = vmul.u32 %v2349_v6, %v3929_v26  ;;  %v2354_v7 = vmul.u32 %v2350_v2, %v2348_v47 }
 0x16e   :  { %v2355_v41 = vshll.u32 %v2352_v17, 16  ;;  %v2357_v5 = vshll.u32 %v2353_v12, 16  ;;  %v2379_v10 = vshll.u32 %v2375_v3, 16  ;;  %vm2381_vm13 = vc.u32 %v2373_v30, %v2377_v42 }
 0x16f   :  { %v2265_v11 = vmul.f32 %v2264_v60, %v2262_v31  ;;  %v2383_v49 = vadd.s32 %v2377_v42, %v2373_v30  ;;  %v2382_v16 = vsel %vm2381_vm13, 1, %v2809_v40  ;;  %v2378_v57 = vshrl.u32 %v2374_v18, 16 }
 0x170   :  { %vm2359_vm14 = vc.u32 %v2351_v0, %v2355_v41  ;;  %v2361_v23 = vadd.s32 %v2355_v41, %v2351_v0  ;;  %v2384_v27 = vadd.s32 %v2382_v16, %v2376_v52  ;;  %v2464_v24 = vsel %vm2463_vm12, %v2462_v55, 0 }
 0x171   :  { %v2266_v28 = vxor.u32 2147483648, %v2265_v11  ;;  %v2360_v34 = vsel %vm2359_vm14, 1, %v2809_v40  ;;  %vm2385_vm15 = vc.u32 %v2383_v49, %v2379_v10  ;;  %v2356_v36 = vshrl.u32 %v2352_v17, 16 }
 0x172   :  { %v2362_v26 = vadd.s32 %v2360_v34, %v2354_v7  ;;  %vm2363_vm0 = vc.u32 %v2361_v23, %v2357_v5  ;;  %v2386_v32 = vsel %vm2385_vm15, 1, %v2809_v40  ;;  %v2466_v58 = vand.u32 31, %v2464_v24 }
 0x173   :  { %v2267_v33 = vsel %vm2146_vm6, %v2266_v28, %v2265_v11  ;;  %v2364_v8 = vsel %vm2363_vm0, 1, %v2809_v40  ;;  %v2388_v37 = vadd.s32 %v2386_v32, %v2384_v27  ;;  %v2358_v51 = vshrl.u32 %v2353_v12, 16 }
 0x174   :  { %v2270_v38 = vsel %vm3992_vm11, %v3705_v9, %v2267_v33  ;;  %v2366_v20 = vadd.s32 %v2364_v8, %v2362_v26  ;;  %v2380_v44 = vshrl.u32 %v2375_v3, 16  ;;  %v4025_v15 = vsub.s32 32, %v2466_v58 }
 0x175   :  { %v2272_v45 = vmul.f32 %v2270_v38, %v2270_v38  ;;  %v2389_v29 = vadd.s32 %v2388_v37, %v2378_v57  ;;  %v2271_v13 = vsel %vm3992_vm11, 0, %v4005_v62  ;;  %v2391_v19 = vmul.u32 %v3917_v1, %v4009_v63 }
 0x176   :  { %v2367_v35 = vadd.s32 %v2366_v20, %v2356_v36  ;;  %v2460_v55 = vor.u32 8388608, %v3998_v4  ;;  %v4035_v18 = vadd.s32 %v2383_v49, %v2379_v10  ;;  %v4037_v31 = vshrl.u32 %v2464_v24, 5 }
 0x177   :  { %v2273_v54 = vmul.f32 -0.001358992, %v2272_v45  ;;  %v2280_v39 = vmul.f32 -0.00019511016, %v2272_v45  ;;  %v2390_v47 = vadd.s32 %v2389_v29, %v2380_v44  ;;  %v2469_v60 = vshll.u32 %v2803_v43, %v2466_v58 }
 0x178   :  { %v4033_v2 = vadd.s32 %v2367_v35, %v2358_v51  ;;  %v2470_v21 = vshrl.u32 %v2804_v46, %v4025_v15  ;;  %v2473_v1 = vshrl.u32 %v2805_v50, %v4025_v15  ;;  %v2472_v63 = vshll.u32 %v2804_v46, %v2466_v58 }
 0x179   :  { %v2274_v14 = vadd.f32 0.041655596, %v2273_v54  ;;  %v2281_v6 = vadd.f32 0.008332121, %v2280_v39  ;;  %v2394_v3 = vadd.s32 1, %v2390_v47  ;;  %v2475_v12 = vshll.u32 %v2805_v50, %v2466_v58 }
 0x17a   :  { %vm2393_vm1 = vc.u32 %v4033_v2, %v4035_v18  ;;  %v2476_v30 = vshrl.u32 %v2806_v53, %v4025_v15  ;;  %v2471_v0 = vor.u32 %v2470_v21, %v2469_v60  ;;  %v2478_v7 = vshll.u32 %v2806_v53, %v2466_v58 }
 0x17b   :  { %v2275_v62 = vmul.f32 %v2274_v14, %v2272_v45  ;;  %v2282_v17 = vmul.f32 %v2281_v6, %v2272_v45  ;;  %v2395_v4 = vsel %vm2393_vm1, %v2394_v3, %v2390_v47  ;;  %v2479_v41 = vshrl.u32 %v2807_v56, %v4025_v15 }
 0x17c   :  { %v2396_v11 = vadd.s32 %v2395_v4, %v2391_v19  ;;  %v2481_v5 = vshll.u32 %v2807_v56, %v2466_v58  ;;  %v2482_v10 = vshrl.u32 %v2808_v59, %v4025_v15  ;;  %v4056_v16 = vor.u32 %v2473_v1, %v2472_v63 }
 0x17d   :  { %v2276_v52 = vadd.f32 -0.4999988, %v2275_v62  ;;  %v2283_v42 = vadd.f32 -0.16666654, %v2282_v17  ;;  %vm2287_vm2 = vweird.f32 %v3705_v9  ;;  %v2288_v34 = vand.u32 3, %v2271_v13 }
 0x17e   :  { %v2397_v23 = vadd.s32 536870912, %v2396_v11  ;;  %v2477_v57 = vor.u32 %v2476_v30, %v2475_v12  ;;  %v2480_v27 = vor.u32 %v2479_v41, %v2478_v7  ;;  %v2483_v33 = vor.u32 %v2482_v10, %v2481_v5  ;;  %v1369_v30 = vpop.f32.mrf.mxu2 }
 0x17f   :  { %v2277_v49 = vmul.f32 %v2276_v52, %v2272_v45  ;;  %v2284_v28 = vmul.f32 %v2283_v42, %v2272_v45  ;;  %vm2487_vm3 = vcmp.lt.s32.totalorder %v4037_v31, 4  ;;  %vm2484_vm4 = vcmp.lt.s32.totalorder %v4037_v31, 1  ;;  %v1410_v52 = vpop.f32.mrf.mxu3 }
 0x180   :  { %v4059_v8 = vshrl.u32 %v2397_v23, 30  ;;  %vm2486_vm5 = vcmp.lt.s32.totalorder %v4037_v31, 3  ;;  %v2493_v37 = vsel %vm2487_vm3, %v2480_v27, 920167782  ;;  %v4066_v24 = vshll.u32 %v2460_v55, 8 }
 0x181   :  { %v2278_v26 = vadd.f32 1.0, %v2277_v49  ;;  %v2285_v32 = vadd.f32 1.0, %v2284_v28  ;;  %v2492_v58 = vsel %vm2484_vm4, %v2471_v0, %v4056_v16  ;;  %vm2289_vm6 = vcmp.lt.s32.totalorder %v2288_v34, 2 }
 0x182   :  { %v2399_v20 = vshll.u32 %v4059_v8, 30  ;;  %vm2290_vm7 = vcmp.eq.s32.totalorder %v2288_v34, 0  ;;  %v2494_v51 = vsel %vm2486_vm5, %v2477_v57, %v2493_v37  ;;  %v2497_v44 = vsel %vm2487_vm3, %v2483_v33, 1326507024 }
 0x183   :  { %v2286_v45 = vmul.f32 %v2285_v32, %v2270_v38  ;;  %v2294_v36 = vxor.u32 2147483648, %v2278_v26  ;;  %vm2485_vm8 = vcmp.lt.s32.totalorder %v4037_v31, 2  ;;  %v2496_v38 = vsel %vm2484_vm4, %v4056_v16, %v2477_v57 }
 0x184   :  { %v4076_v54 = vsub.s32 %v2396_v11, %v2399_v20  ;;  %vm2293_vm9 = vcmp.eq.s32.totalorder %v2288_v34, 2  ;;  %v2495_v39 = vsel %vm2485_vm8, %v2492_v58, %v2494_v51  ;;  %v2498_v35 = vsel %vm2486_vm5, %v2480_v27, %v2497_v44 }
 0x185   :  { %v2291_v29 = vxor.u32 2147483648, %v2286_v45  ;;  %v2501_v13 = vand.u32 65535, %v4066_v24  ;;  %v2295_v19 = vsel %vm2293_vm9, %v2294_v36, %v2286_v45  ;;  %v2499_v6 = vsel %vm2485_vm8, %v2496_v38, %v2498_v35 }
 0x186   :  { %vm2401_vm10 = vcmp.lt.s32.totalorder %v4076_v54, 0  ;;  %v2402_v55 = vsub.s32 0, %v4076_v54  ;;  %v2525_v3 = vand.u32 65535, %v2495_v39  ;;  %v2526_v60 = vshrl.u32 %v2495_v39, 16  ;;  %v1440_v39 = vpop.f32.mrf.mxu0 }
 0x187   :  { %v2292_v47 = vsel %vm2290_vm7, %v2278_v26, %v2291_v29  ;;  %v2468_v17 = vshrl.u32 %v2803_v43, %v4025_v15  ;;  %v2502_v1 = vshrl.u32 %v4066_v24, 16  ;;  %v2503_v63 = vand.u32 65535, %v2499_v6 }
 0x188   :  { %v2296_v14 = vsel %vm2289_vm6, %v2292_v47, %v2295_v19  ;;  %v2403_v62 = vsel %vm2401_vm10, %v2402_v55, %v4076_v54  ;;  %v2504_v12 = vshrl.u32 %v2499_v6, 16  ;;  %v2392_v9 = vadd.s32 %v4035_v18, %v4033_v2 }
 0x189   :  { %v2297_v21 = vsel %vm2287_vm2, nan, %v2296_v14  ;;  %v2404_v4 = vclz %v2403_v62  ;;  %v2488_v42 = vsel %vm2484_vm4, %v2468_v17, %v2471_v0  ;;  %v2528_v11 = vmul.u32 %v2526_v60, %v2501_v13  ;;  %v1467_v14 = vpop.f32.mrf.mxu1 }
 0x18a   :  { %2764 = vst [vmem:[%s4257_s2 + $0x20] sm:$0xff] %v2297_v21  ;;  %v2529_v7 = vmul.u32 %v2525_v3, %v2502_v1  ;;  %v2489_v41 = vsel %vm2487_vm3, %v2477_v57, 2102212464  ;;  %v2506_v5 = vmul.u32 %v2504_v12, %v2501_v13  ;;  %v2507_v10 = vmul.u32 %v2503_v63, %v2502_v1 }
 0x18b   :  { %v2788_v15 = vadd.s32 4294967294, %v2404_v4  ;;  %v2527_v49 = vmul.u32 %v2525_v3, %v2501_v13  ;;  %v2530_v28 = vmul.u32 %v2526_v60, %v2502_v1  ;;  %v2531_v23 = vshll.u32 %v2528_v11, 16 }
 0x18c   :  { %v1411_v34 = vadd.f32 %v1410_v52, %v1369_v30  ;;  %v2505_v27 = vmul.u32 %v2503_v63, %v2501_v13  ;;  %v2508_v33 = vmul.u32 %v2504_v12, %v2502_v1  ;;  %v2509_v26 = vshll.u32 %v2506_v5, 16  ;;  %v1500_v1 = vpop.f32.mrf.mxu2 }
 0x18d   :  { %vm2789_vm11 = vcmp.lt.s32.totalorder %v2788_v15, 0  ;;  %v2511_v18 = vshll.u32 %v2507_v10, 16  ;;  %v2533_v32 = vshll.u32 %v2529_v7, 16  ;;  %vm2535_vm12 = vc.u32 %v2527_v49, %v2531_v23 }
 0x18e   :  { %v2407_v2 = vsel %vm2789_vm11, 0, %v2788_v15  ;;  %vm2513_vm13 = vc.u32 %v2505_v27, %v2509_v26  ;;  %v2515_v36 = vadd.s32 %v2509_v26, %v2505_v27  ;;  %v2536_v20 = vsel %vm2535_vm12, 1, %v2809_v40 }
 0x18f   :  { %v2408_v0 = vsub.s32 32, %v2407_v2  ;;  %v2409_v37 = vshll.u32 %v4076_v54, %v2407_v2  ;;  %v2412_v45 = vsub.s32 4294967266, %v2407_v2  ;;  %v2514_v57 = vsel %vm2513_vm13, 1, %v2809_v40 }
 0x190   :  { %v2537_v58 = vadd.s32 %v2531_v23, %v2527_v49  ;;  %v2516_v29 = vadd.s32 %v2514_v57, %v2508_v33  ;;  %v2538_v38 = vadd.s32 %v2536_v20, %v2530_v28  ;;  %v2490_v35 = vsel %vm2486_vm5, %v4056_v16, %v2489_v41 }
 0x191   :  { %v2410_v51 = vshrl.u32 %v2392_v9, %v2408_v0  ;;  %v2413_v44 = vadd.s32 127, %v2412_v45  ;;  %vm2517_vm14 = vc.u32 %v2515_v36, %v2511_v18  ;;  %v2532_v13 = vshrl.u32 %v2528_v11, 16  ;;  %v1525_v11 = vpop.f32.mrf.mxu3 }
 0x192   :  { %vm2539_vm15 = vc.u32 %v2537_v58, %v2533_v32  ;;  %v2518_v19 = vsel %vm2517_vm14, 1, %v2809_v40  ;;  %v2510_v6 = vshrl.u32 %v2506_v5, 16  ;;  %v1441_v21 = vadd.f32 %v1440_v39, %v1411_v34 }
 0x193   :  { %v2411_v54 = vor.u32 %v2410_v51, %v2409_v37  ;;  %v2414_v47 = vshll.u32 %v2413_v44, 23  ;;  %v2540_v55 = vsel %vm2539_vm15, 1, %v2809_v40  ;;  %v2520_v3 = vadd.s32 %v2518_v19, %v2516_v29 }
 0x194   :  { %v2542_v60 = vadd.s32 %v2540_v55, %v2538_v38  ;;  %v2512_v17 = vshrl.u32 %v2507_v10, 16  ;;  %v2534_v63 = vshrl.u32 %v2529_v7, 16  ;;  %v1468_v12 = vadd.f32 %v1467_v14, %v1441_v21 }
 0x195   :  { %v2415_v62 = vor.u32 4788187, %v2414_v47  ;;  %v2521_v4 = vadd.s32 %v2520_v3, %v2510_v6  ;;  %v2418_v52 = vcvt.s32.f32 %v2411_v54  ;;  %v2491_v9 = vsel %vm2485_vm8, %v2488_v42, %v2490_v35 }
 0x196   :  { %v2543_v16 = vadd.s32 %v2542_v60, %v2532_v13  ;;  %v2541_v41 = vadd.s32 %v2537_v58, %v2533_v32  ;;  %v1501_v5 = vadd.f32 %v1500_v1, %v1468_v12  ;;  %v2422_v7 = vsub.s32 4, %v4059_v8 }
 0x197   :  { %v2416_v30 = vand.u32 2147483647, %v2415_v62  ;;  %v2522_v15 = vadd.s32 %v2521_v4, %v2512_v17  ;;  %v2545_v27 = vmul.u32 %v4066_v24, %v2491_v9  ;;  %vm2300_vm1 = vcmp.lt.s32.totalorder %v3892_v22, 0 }
 0x198   :  { %v2544_v49 = vadd.s32 %v2543_v16, %v2534_v63  ;;  %v4117_v34 = vadd.f32 %v1525_v11, %v1501_v5  ;;  %vm4125_vm2 = vcmp.le.f32.partialorder %v2298_v25, 0.7853982  ;;  %v2423_v24 = vsel %vm2300_vm1, %v2422_v7, %v4059_v8 }
 0x199   :  { %v2419_v28 = vmul.f32 %v2418_v52, %v2416_v30  ;;  %vm2547_vm0 = vc.u32 %v2522_v15, %v2541_v41  ;;  %v2425_v25 = vsel %vm4125_vm2, 0, %v2423_v24  ;;  %vm2441_vm7 = vweird.f32 %v3892_v22 }
 0x19a   :  { %v2548_v23 = vadd.s32 1, %v2544_v49  ;;  %v2609_v31 = vand.u32 2139095040, %v4117_v34  ;;  %v2606_v58 = vand.u32 2147483647, %v4117_v34  ;;  %v2442_v35 = vand.u32 3, %v2425_v25 }
 0x19b   :  { %v2420_v10 = vxor.u32 2147483648, %v2419_v28  ;;  %v2546_v62 = vadd.s32 %v2541_v41, %v2522_v15  ;;  %vm4202_vm14 = vcmp.le.f32.partialorder %v2452_v48, 0.7853982  ;;  %vm2454_vm15 = vcmp.lt.s32.totalorder %v3904_v61, 0 }
 0x19c   :  { %v2549_v33 = vsel %vm2547_vm0, %v2548_v23, %v2544_v49  ;;  %v2610_v32 = vshrl.u32 %v2609_v31, 23  ;;  %v2613_v54 = vand.u32 8388607, %v2606_v58  ;;  %vm2443_vm5 = vcmp.lt.s32.totalorder %v2442_v35, 2 }
 0x19d   :  { %v2421_v26 = vsel %vm2300_vm1, %v2420_v10, %v2419_v28  ;;  %v2550_v2 = vadd.s32 %v2549_v33, %v2545_v27  ;;  %vm2444_vm6 = vcmp.eq.s32.totalorder %v2442_v35, 0  ;;  %vm2447_vm8 = vcmp.eq.s32.totalorder %v2442_v35, 2 }
 0x19e   :  { %v2424_v18 = vsel %vm4125_vm2, %v3892_v22, %v2421_v26  ;;  %v2793_v45 = vadd.s32 4294967169, %v2610_v32  ;;  %v2614_v1 = vor.u32 8388608, %v2613_v54 }
 0x19f   :  { %v2426_v0 = vmul.f32 %v2424_v18, %v2424_v18  ;;  %v2551_v37 = vadd.s32 536870912, %v2550_v2 }
 0x1a0   :  { %v2616_v51 = vadd.s32 1, %v2793_v45  ;;  %v4182_v22 = vshll.u32 %v2614_v1, 8 }
 0x1a1   :  { %v2427_v57 = vmul.f32 -0.001358992, %v2426_v0  ;;  %v2434_v36 = vmul.f32 -0.00019511016, %v2426_v0  ;;  %v4133_v20 = vshrl.u32 %v2551_v37, 30 }
 0x1a2   :  { %vm2617_vm3 = vcmp.gt.s32.totalorder %v2616_v51, 0 }
 0x1a3   :  { %v2428_v44 = vadd.f32 0.041655596, %v2427_v57  ;;  %v2435_v29 = vadd.f32 0.008332121, %v2434_v36  ;;  %v2553_v38 = vshll.u32 %v4133_v20, 30  ;;  %v2618_v47 = vsel %vm2617_vm3, %v2616_v51, 0 }
 0x1a4   :  { %v2620_v6 = vand.u32 31, %v2618_v47  ;;  %v4142_v16 = vshrl.u32 %v2618_v47, 5 }
 0x1a5   :  { %v2429_v39 = vmul.f32 %v2428_v44, %v2426_v0  ;;  %v2436_v8 = vmul.f32 %v2435_v29, %v2426_v0  ;;  %v2554_v13 = vsub.s32 %v2550_v2, %v2553_v38 }
 0x1a6   :  { %v4144_v12 = vsub.s32 32, %v2620_v6  ;;  %v2623_v52 = vshll.u32 %v2803_v43, %v2620_v6  ;;  %v2626_v9 = vshll.u32 %v2804_v46, %v2620_v6  ;;  %v2629_v11 = vshll.u32 %v2805_v50, %v2620_v6 }
 0x1a7   :  { %v2430_v19 = vadd.f32 -0.4999988, %v2429_v39  ;;  %v2437_v55 = vadd.f32 -0.16666654, %v2436_v8  ;;  %vm2555_vm4 = vcmp.lt.s32.totalorder %v2554_v13, 0  ;;  %v2556_v14 = vsub.s32 0, %v2554_v13 }
 0x1a8   :  { %v2624_v15 = vshrl.u32 %v2804_v46, %v4144_v12  ;;  %v2632_v41 = vshll.u32 %v2806_v53, %v2620_v6  ;;  %v2627_v28 = vshrl.u32 %v2805_v50, %v4144_v12  ;;  %v2630_v23 = vshrl.u32 %v2806_v53, %v4144_v12 }
 0x1a9   :  { %v2431_v3 = vmul.f32 %v2430_v19, %v2426_v0  ;;  %v2438_v60 = vmul.f32 %v2437_v55, %v2426_v0  ;;  %v2557_v21 = vsel %vm2555_vm4, %v2556_v14, %v2554_v13  ;;  %v2633_v10 = vshrl.u32 %v2807_v56, %v4144_v12 }
 0x1aa   :  { %v2558_v17 = vclz %v2557_v21  ;;  %v4159_v31 = vor.u32 %v2624_v15, %v2623_v52  ;;  %v4161_v2 = vor.u32 %v2627_v28, %v2626_v9  ;;  %v2631_v50 = vor.u32 %v2630_v23, %v2629_v11 }
 0x1ab   :  { %v2432_v4 = vadd.f32 1.0, %v2431_v3  ;;  %v2439_v63 = vadd.f32 1.0, %v2438_v60  ;;  %v2634_v32 = vor.u32 %v2633_v10, %v2632_v41  ;;  %v2635_v53 = vshll.u32 %v2807_v56, %v2620_v6 }
 0x1ac   :  { %v2791_v30 = vadd.s32 4294967294, %v2558_v17  ;;  %v2636_v45 = vshrl.u32 %v2808_v59, %v4144_v12  ;;  %vm2638_vm10 = vcmp.lt.s32.totalorder %v4142_v16, 1  ;;  %vm2641_vm11 = vcmp.lt.s32.totalorder %v4142_v16, 4 }
 0x1ad   :  { %v2440_v49 = vmul.f32 %v2439_v63, %v2424_v18  ;;  %v2448_v5 = vxor.u32 2147483648, %v2432_v4  ;;  %vm2640_vm12 = vcmp.lt.s32.totalorder %v4142_v16, 3  ;;  %v2646_v56 = vsel %vm2638_vm10, %v4159_v31, %v4161_v2 }
 0x1ae   :  { %vm2792_vm9 = vcmp.lt.s32.totalorder %v2791_v30, 0  ;;  %v2637_v51 = vor.u32 %v2636_v45, %v2635_v53  ;;  %v2647_v59 = vsel %vm2641_vm11, %v2634_v32, 920167782  ;;  %vm2639_vm13 = vcmp.lt.s32.totalorder %v4142_v16, 2 }
 0x1af   :  { %v2445_v7 = vxor.u32 2147483648, %v2440_v49  ;;  %v2449_v27 = vsel %vm2447_vm8, %v2448_v5, %v2440_v49  ;;  %v2561_v33 = vsel %vm2792_vm9, 0, %v2791_v30  ;;  %v2648_v29 = vsel %vm2640_vm12, %v2631_v50, %v2647_v59 }
 0x1b0   :  { %v2562_v42 = vsub.s32 32, %v2561_v33  ;;  %v2563_v46 = vshll.u32 %v2554_v13, %v2561_v33  ;;  %v2566_v26 = vsub.s32 4294967266, %v2561_v33  ;;  %v2649_v38 = vsel %vm2639_vm13, %v2646_v56, %v2648_v29 }
 0x1b1   :  { %v2446_v18 = vsel %vm2444_vm6, %v2432_v4, %v2445_v7  ;;  %v2650_v39 = vsel %vm2638_vm10, %v4161_v2, %v2631_v50  ;;  %v2651_v8 = vsel %vm2641_vm11, %v2637_v51, 1326507024  ;;  %v2680_v47 = vshrl.u32 %v2649_v38, 16 }
 0x1b2   :  { %v2450_v24 = vsel %vm2443_vm5, %v2446_v18, %v2449_v27  ;;  %v2564_v0 = vshrl.u32 %v2546_v62, %v2562_v42  ;;  %v2567_v37 = vadd.s32 127, %v2566_v26  ;;  %v2652_v54 = vsel %vm2640_vm12, %v2634_v32, %v2651_v8 }
 0x1b3   :  { %v2451_v57 = vsel %vm2441_vm7, nan, %v2450_v24  ;;  %v2653_v19 = vsel %vm2639_vm13, %v2650_v39, %v2652_v54  ;;  %v2655_v55 = vand.u32 65535, %v4182_v22  ;;  %v2679_v14 = vand.u32 65535, %v2649_v38 }
 0x1b4   :  { %2765 = vst [vmem:[%s4257_s2 + $0x28] sm:$0xff] %v2451_v57  ;;  %v2565_v36 = vor.u32 %v2564_v0, %v2563_v46  ;;  %v2568_v25 = vshll.u32 %v2567_v37, 23  ;;  %v2656_v3 = vshrl.u32 %v4182_v22, 16  ;;  %v2657_v60 = vand.u32 65535, %v2653_v19 }
 0x1b5   :  { %v2658_v21 = vshrl.u32 %v2653_v19, 16  ;;  %v2682_v17 = vmul.u32 %v2680_v47, %v2655_v55  ;;  %v2576_v4 = vsub.s32 4, %v4133_v20  ;;  %v2643_v52 = vsel %vm2641_vm11, %v2631_v50, 2102212464 }
 0x1b6   :  { %v2569_v44 = vor.u32 4788187, %v2568_v25  ;;  %v2572_v13 = vcvt.s32.f32 %v2565_v36  ;;  %v2661_v30 = vmul.u32 %v2657_v60, %v2656_v3  ;;  %v2681_v9 = vmul.u32 %v2679_v14, %v2655_v55 }
 0x1b7   :  { %v2660_v63 = vmul.u32 %v2658_v21, %v2655_v55  ;;  %v2683_v11 = vmul.u32 %v2679_v14, %v2656_v3  ;;  %v2685_v49 = vshll.u32 %v2682_v17, 16  ;;  %v2659_v5 = vmul.u32 %v2657_v60, %v2655_v55 }
 0x1b8   :  { %v2570_v35 = vand.u32 2147483647, %v2569_v44  ;;  %v2684_v41 = vmul.u32 %v2680_v47, %v2656_v3  ;;  %v2662_v23 = vmul.u32 %v2658_v21, %v2656_v3  ;;  %v2665_v10 = vshll.u32 %v2661_v30, 16 }
 0x1b9   :  { %v2663_v15 = vshll.u32 %v2660_v63, 16  ;;  %vm2689_vm0 = vc.u32 %v2681_v9, %v2685_v49  ;;  %v2687_v46 = vshll.u32 %v2683_v11, 16  ;;  %v2691_v26 = vadd.s32 %v2685_v49, %v2681_v9 }
 0x1ba   :  { %v2573_v6 = vmul.f32 %v2572_v13, %v2570_v35  ;;  %v2690_v33 = vsel %vm2689_vm0, 1, %v2809_v40  ;;  %v2622_v24 = vshrl.u32 %v2803_v43, %v4144_v12  ;;  %v2664_v0 = vshrl.u32 %v2660_v63, 16 }
 0x1bb   :  { %vm2667_vm1 = vc.u32 %v2659_v5, %v2663_v15  ;;  %v2669_v27 = vadd.s32 %v2663_v15, %v2659_v5  ;;  %v2692_v18 = vadd.s32 %v2690_v33, %v2684_v41  ;;  %vm2693_vm3 = vc.u32 %v2691_v26, %v2687_v46 }
 0x1bc   :  { %v2574_v1 = vxor.u32 2147483648, %v2573_v6  ;;  %v2668_v42 = vsel %vm2667_vm1, 1, %v2809_v40  ;;  %v2694_v25 = vsel %vm2693_vm3, 1, %v2809_v40  ;;  %v2642_v51 = vsel %vm2638_vm10, %v2622_v24, %v4159_v31 }
 0x1bd   :  { %v2670_v53 = vadd.s32 %v2668_v42, %v2662_v23  ;;  %vm2671_vm2 = vc.u32 %v2669_v27, %v2665_v10  ;;  %v2644_v56 = vsel %vm2640_vm12, %v4161_v2, %v2643_v52  ;;  %v2686_v59 = vshrl.u32 %v2682_v17, 16 }
 0x1be   :  { %v2575_v48 = vsel %vm2454_vm15, %v2574_v1, %v2573_v6  ;;  %v2672_v37 = vsel %vm2671_vm2, 1, %v2809_v40  ;;  %v2696_v44 = vadd.s32 %v2694_v25, %v2692_v18  ;;  %v2666_v29 = vshrl.u32 %v2661_v30, 16 }
 0x1bf   :  { %v2578_v28 = vsel %vm4202_vm14, %v3904_v61, %v2575_v48  ;;  %v2674_v36 = vadd.s32 %v2672_v37, %v2670_v53  ;;  %v2577_v39 = vsel %vm2454_vm15, %v2576_v4, %v4133_v20  ;;  %v2688_v8 = vshrl.u32 %v2683_v11, 16 }
 0x1c0   :  { %v2580_v7 = vmul.f32 %v2578_v28, %v2578_v28  ;;  %v2697_v40 = vadd.s32 %v2696_v44, %v2686_v59  ;;  %v2695_v31 = vadd.s32 %v2691_v26, %v2687_v46  ;;  %v2645_v47 = vsel %vm2639_vm13, %v2642_v51, %v2644_v56 }
 0x1c1   :  { %v2675_v38 = vadd.s32 %v2674_v36, %v2664_v0  ;;  %v2579_v19 = vsel %vm4202_vm14, 0, %v2577_v39  ;;  %v2699_v20 = vmul.u32 %v4182_v22, %v2645_v47  ;;  %vm2595_vm8 = vweird.f32 %v3904_v61 }
 0x1c2   :  { %v2581_v50 = vmul.f32 -0.001358992, %v2580_v7  ;;  %v2588_v32 = vmul.f32 -0.00019511016, %v2580_v7  ;;  %v2698_v2 = vadd.s32 %v2697_v40, %v2688_v8  ;;  %v2596_v21 = vand.u32 3, %v2579_v19 }
 0x1c3   :  { %v2676_v54 = vadd.s32 %v2675_v38, %v2666_v29  ;;  %vm2608_vm11 = vcmp.lt.s32.totalorder %v4117_v34, 0  ;;  %vm4242_vm12 = vcmp.le.f32.partialorder %v2606_v58, 0.7853982  ;;  %vm2749_vm0 = vweird.f32 %v4117_v34 }
 0x1c4   :  { %v2582_v45 = vadd.f32 0.041655596, %v2581_v50  ;;  %v2589_v57 = vadd.f32 0.008332121, %v2588_v32  ;;  %v2702_v6 = vadd.s32 1, %v2698_v2  ;;  %vm2598_vm5 = vcmp.eq.s32.totalorder %v2596_v21, 0 }
 0x1c5   :  { %vm2701_vm4 = vc.u32 %v2676_v54, %v2695_v31  ;;  %vm2601_vm6 = vcmp.eq.s32.totalorder %v2596_v21, 2  ;;  %vm2597_vm7 = vcmp.lt.s32.totalorder %v2596_v21, 2  ;;  %v2700_v10 = vadd.s32 %v2695_v31, %v2676_v54 }
 0x1c6   :  { %v2583_v43 = vmul.f32 %v2582_v45, %v2580_v7  ;;  %v2590_v12 = vmul.f32 %v2589_v57, %v2580_v7  ;;  %v2703_v17 = vsel %vm2701_vm4, %v2702_v6, %v2698_v2 }
 0x1c7   :  { %v2704_v63 = vadd.s32 %v2703_v17, %v2699_v20 }
 0x1c8   :  { %v2584_v35 = vadd.f32 -0.4999988, %v2583_v43  ;;  %v2591_v13 = vadd.f32 -0.16666654, %v2590_v12 }
 0x1c9   :  { %v2705_v16 = vadd.s32 536870912, %v2704_v63 }
 0x1ca   :  { %v2585_v55 = vmul.f32 %v2584_v35, %v2580_v7  ;;  %v2592_v14 = vmul.f32 %v2591_v13, %v2580_v7 }
 0x1cb   :  { %v2706_v9 = vshrl.u32 %v2705_v16, 30 }
 0x1cc   :  { %v2586_v3 = vadd.f32 1.0, %v2585_v55  ;;  %v2593_v60 = vadd.f32 1.0, %v2592_v14 }
 0x1cd   :  { %v2707_v48 = vshll.u32 %v2706_v9, 30  ;;  %v2730_v51 = vsub.s32 4, %v2706_v9 }
 0x1ce   :  { %v2594_v1 = vmul.f32 %v2593_v60, %v2578_v28  ;;  %v2602_v4 = vxor.u32 2147483648, %v2586_v3 }
 0x1cf   :  { %v2708_v22 = vsub.s32 %v2704_v63, %v2707_v48  ;;  %v2731_v12 = vsel %vm2608_vm11, %v2730_v51, %v2706_v9 }
 0x1d0   :  { %v2599_v30 = vxor.u32 2147483648, %v2594_v1  ;;  %v2603_v52 = vsel %vm2601_vm6, %v2602_v4, %v2594_v1  ;;  %v2733_v58 = vsel %vm4242_vm12, 0, %v2731_v12 }
 0x1d1   :  { %vm2709_vm9 = vcmp.lt.s32.totalorder %v2708_v22, 0  ;;  %v2710_v5 = vsub.s32 0, %v2708_v22  ;;  %v2750_v13 = vand.u32 3, %v2733_v58 }
 0x1d2   :  { %v2600_v62 = vsel %vm2598_vm5, %v2586_v3, %v2599_v30 }
 0x1d3   :  { %v2604_v11 = vsel %vm2597_vm7, %v2600_v62, %v2603_v52  ;;  %v2711_v15 = vsel %vm2709_vm9, %v2710_v5, %v2708_v22  ;;  %vm2752_vm13 = vcmp.eq.s32.totalorder %v2750_v13, 0  ;;  %vm2755_vm14 = vcmp.eq.s32.totalorder %v2750_v13, 2 }
 0x1d4   :  { %v2605_v49 = vsel %vm2595_vm8, nan, %v2604_v11  ;;  %v2712_v41 = vclz %v2711_v15  ;;  %vm2751_vm15 = vcmp.lt.s32.totalorder %v2750_v13, 2 }
 0x1d5   :  { %2766 = vst [vmem:[%s4257_s2 + $0x30] sm:$0xff] %v2605_v49 }
 0x1d6   :  { %v2794_v28 = vadd.s32 4294967294, %v2712_v41 }
 0x1d8   :  { %vm2795_vm10 = vcmp.lt.s32.totalorder %v2794_v28, 0 }
 0x1d9   :  { %v2715_v23 = vsel %vm2795_vm10, 0, %v2794_v28 }
 0x1da   :  { %v2716_v7 = vsub.s32 32, %v2715_v23  ;;  %v2720_v27 = vsub.s32 4294967266, %v2715_v23  ;;  %v2717_v33 = vshll.u32 %v2708_v22, %v2715_v23 }
 0x1dc   :  { %v2718_v61 = vshrl.u32 %v2700_v10, %v2716_v7  ;;  %v2721_v42 = vadd.s32 127, %v2720_v27 }
 0x1de   :  { %v2719_v46 = vor.u32 %v2718_v61, %v2717_v33  ;;  %v2722_v26 = vshll.u32 %v2721_v42, 23 }
 0x1e0   :  { %v2723_v18 = vor.u32 4788187, %v2722_v26  ;;  %v2726_v32 = vcvt.s32.f32 %v2719_v46 }
 0x1e2   :  { %v2724_v50 = vand.u32 2147483647, %v2723_v18 }
 0x1e4   :  { %v2727_v53 = vmul.f32 %v2726_v32, %v2724_v50 }
 0x1e6   :  { %v2728_v24 = vxor.u32 2147483648, %v2727_v53 }
 0x1e8   :  { %v2729_v37 = vsel %vm2608_vm11, %v2728_v24, %v2727_v53 }
 0x1e9   :  { %v2732_v45 = vsel %vm4242_vm12, %v4117_v34, %v2729_v37 }
 0x1ea   :  { %v2734_v57 = vmul.f32 %v2732_v45, %v2732_v45 }
 0x1ec   :  { %v2735_v36 = vmul.f32 -0.001358992, %v2734_v57  ;;  %v2742_v25 = vmul.f32 -0.00019511016, %v2734_v57 }
 0x1ee   :  { %v2736_v56 = vadd.f32 0.041655596, %v2735_v36  ;;  %v2743_v59 = vadd.f32 0.008332121, %v2742_v25 }
 0x1f0   :  { %v2737_v44 = vmul.f32 %v2736_v56, %v2734_v57  ;;  %v2744_v43 = vmul.f32 %v2743_v59, %v2734_v57 }
 0x1f2   :  { %v2738_v29 = vadd.f32 -0.4999988, %v2737_v44  ;;  %v2745_v38 = vadd.f32 -0.16666654, %v2744_v43 }
 0x1f4   :  { %v2739_v39 = vmul.f32 %v2738_v29, %v2734_v57  ;;  %v2746_v8 = vmul.f32 %v2745_v38, %v2734_v57 }
 0x1f6   :  { %v2740_v40 = vadd.f32 1.0, %v2739_v39  ;;  %v2747_v35 = vadd.f32 1.0, %v2746_v8 }
 0x1f8   :  { %v2748_v54 = vmul.f32 %v2747_v35, %v2732_v45  ;;  %v2756_v31 = vxor.u32 2147483648, %v2740_v40 }
 0x1fa   :  { %v2753_v47 = vxor.u32 2147483648, %v2748_v54  ;;  %v2757_v19 = vsel %vm2755_vm14, %v2756_v31, %v2748_v54 }
 0x1fc   :  { %v2754_v2 = vsel %vm2752_vm13, %v2740_v40, %v2753_v47 }
 0x1fd   :  { %v2758_v55 = vsel %vm2751_vm15, %v2754_v2, %v2757_v19 }
 0x1fe   :  { %v2759_v14 = vsel %vm2749_vm0, nan, %v2758_v55 }
 0x1ff   :  { %2767 = vst [vmem:[%s4257_s2 + $0x38] sm:$0xff] %v2759_v14 }

</bundles_post_ra>
